<compile_context>
chip_gen: v7x
topology: tpu7x:2x2x1
jax: 0.10.0
libtpu: 0.0.40
codegen_flags: <defaults>
</compile_context>

<pallas_src>
import math
import functools

import jax
import jax.numpy as jnp
from jax import lax
from jax.experimental import pallas as pl
from jax.experimental.pallas import tpu as pltpu


MASK_VALUE = -1e30  # large finite negative (avoids inf-inf -> NaN in online softmax)


def _pick_tile(dim, candidates):
    """Largest candidate tile that evenly divides `dim`; fall back to the full dim."""
    for c in candidates:
        if c <= dim and dim % c == 0:
            return c
    return dim


# ----------------------------- RoPE epilogue helper ---------------------------


def _rope_rotate_tile(acc, cos, sin, head_dim):
    """Apply RoPE to a (tm, tn) f32 tile where tn is a multiple of head_dim.

    rotate_half is pltpu.roll (XLU slot) + a sign mask, so it is nearly free inside
    an MXU-bound writeback epilogue.
    """
    half = head_dim // 2
    sign = jnp.where(
        lax.broadcasted_iota(jnp.int32, (1, head_dim), 1) < half, -1.0, 1.0)
    n_heads = acc.shape[1] // head_dim
    outs = []
    for t in range(n_heads):
        a = acc[:, t * head_dim:(t + 1) * head_dim]
        rot = pltpu.roll(a, shift=half, axis=1) * sign
        outs.append(a * cos + rot * sin)
    return outs[0] if n_heads == 1 else jnp.concatenate(outs, axis=1)


# ----------------------------- tiled linear kernels ---------------------------


def _matmul_kernel(x_ref, w_ref, o_ref, acc_ref):
    @pl.when(pl.program_id(2) == 0)
    def _init():
        acc_ref[...] = jnp.zeros_like(acc_ref)

    acc_ref[...] += jnp.dot(x_ref[...], w_ref[...],
                            preferred_element_type=jnp.float32)

    @pl.when(pl.program_id(2) == pl.num_programs(2) - 1)
    def _done():
        o_ref[...] = acc_ref[...].astype(o_ref.dtype)


def _matmul_rope_kernel(x_ref, w_ref, cos_ref, sin_ref, o_ref, acc_ref, *,
                        head_dim, out_scale):
    @pl.when(pl.program_id(2) == 0)
    def _init():
        acc_ref[...] = jnp.zeros_like(acc_ref)

    acc_ref[...] += jnp.dot(x_ref[...], w_ref[...],
                            preferred_element_type=jnp.float32)

    @pl.when(pl.program_id(2) == pl.num_programs(2) - 1)
    def _done():
        out = _rope_rotate_tile(acc_ref[...], cos_ref[...], sin_ref[...], head_dim)
        if out_scale != 1.0:
            out = out * out_scale
        o_ref[...] = out.astype(o_ref.dtype)


def linear(x, w_t, *, cos=None, sin=None, head_dim=None, out_scale=1.0,
           tm=256, tn=256, tk=512):
    """x: (M, K), w_t: (K, N) pre-transposed weight -> (M, N).

    If cos/sin are given, RoPE (per head_dim chunk) and out_scale are fused into the
    writeback epilogue (used for the q projection, with out_scale = 1/sqrt(hd)).
    """
    M, K = x.shape
    K2, N = w_t.shape
    assert K == K2
    fuse_rope = cos is not None
    tm = _pick_tile(M, (tm, 128, 64, 32, 16, 8))
    tn = _pick_tile(N, (tn, 256, 128))
    tk = _pick_tile(K, (tk, 256, 128))
    if fuse_rope and tn % head_dim != 0:
        tn = head_dim  # head_dim always divides N = n_heads * head_dim
    grid = (M // tm, N // tn, K // tk)

    cost = pl.CostEstimate(
        flops=2 * M * K * N, transcendentals=0,
        bytes_accessed=(M * K + K * N + M * N) * x.dtype.itemsize)

    if fuse_rope:
        kernel = functools.partial(_matmul_rope_kernel, head_dim=head_dim,
                                   out_scale=out_scale)
        in_specs = [
            pl.BlockSpec((tm, tk), lambda i, j, k: (i, k)),
            pl.BlockSpec((tk, tn), lambda i, j, k: (k, j)),
            # cos/sin block index is constant across (j, k): DMA'd once per row tile.
            pl.BlockSpec((tm, head_dim), lambda i, j, k: (i, 0)),
            pl.BlockSpec((tm, head_dim), lambda i, j, k: (i, 0)),
        ]
        args = (x, w_t, cos, sin)
    else:
        kernel = _matmul_kernel
        in_specs = [
            pl.BlockSpec((tm, tk), lambda i, j, k: (i, k)),
            pl.BlockSpec((tk, tn), lambda i, j, k: (k, j)),
        ]
        args = (x, w_t)

    return pl.pallas_call(
        kernel,
        out_shape=jax.ShapeDtypeStruct((M, N), x.dtype),
        grid_spec=pltpu.PrefetchScalarGridSpec(
            num_scalar_prefetch=0,
            grid=grid,
            in_specs=in_specs,
            out_specs=pl.BlockSpec((tm, tn), lambda i, j, k: (i, j)),
            scratch_shapes=[pltpu.VMEM((tm, tn), jnp.float32)]),
        compiler_params=pltpu.CompilerParams(
            dimension_semantics=("parallel", "parallel", "arbitrary")),
        cost_estimate=cost,
    )(*args)


# ------------------------- multiway (2-expert) linear ------------------------


def _mw_accumulate(need0_ref, need1_ref, x_ref, sel_ref, w0_ref, w1_ref, acc_ref):
    i = pl.program_id(0)

    @pl.when(pl.program_id(2) == 0)
    def _init():
        acc_ref[...] = jnp.zeros_like(acc_ref)

    # Expert matmuls gated per row tile by scalar-prefetch flags: tiles whose rows all
    # use one expert pay only that expert's FLOPs.
    @pl.when(need0_ref[i] > 0)
    def _expert0():
        x = x_ref[...]
        acc_ref[...] += jnp.dot(x - x * sel_ref[...], w0_ref[...],
                                preferred_element_type=jnp.float32)

    @pl.when(need1_ref[i] > 0)
    def _expert1():
        acc_ref[...] += jnp.dot(x_ref[...] * sel_ref[...], w1_ref[...],
                                preferred_element_type=jnp.float32)


def _mw_matmul_kernel(need0_ref, need1_ref, x_ref, sel_ref, w0_ref, w1_ref,
                      o_ref, acc_ref):
    _mw_accumulate(need0_ref, need1_ref, x_ref, sel_ref, w0_ref, w1_ref, acc_ref)

    @pl.when(pl.program_id(2) == pl.num_programs(2) - 1)
    def _done():
        o_ref[...] = acc_ref[...].astype(o_ref.dtype)


def _mw_matmul_rope_kernel(need0_ref, need1_ref, x_ref, sel_ref, w0_ref, w1_ref,
                           cos_ref, sin_ref, o_ref, acc_ref, *, head_dim, out_scale):
    _mw_accumulate(need0_ref, need1_ref, x_ref, sel_ref, w0_ref, w1_ref, acc_ref)

    @pl.when(pl.program_id(2) == pl.num_programs(2) - 1)
    def _done():
        out = _rope_rotate_tile(acc_ref[...], cos_ref[...], sin_ref[...], head_dim)
        if out_scale != 1.0:
            out = out * out_scale
        o_ref[...] = out.astype(o_ref.dtype)


def multiway_linear(x, w0_t, w1_t, indicators, *, cos=None, sin=None,
                    head_dim=None, out_scale=1.0, tm=256, tn=256, tk=512):
    """MultiwayNetwork(num_multiway=2): row m uses expert indicators[m] (0 or 1)."""
    M, K = x.shape
    K2, N = w0_t.shape
    assert K == K2 and w1_t.shape == w0_t.shape
    fuse_rope = cos is not None
    tm = _pick_tile(M, (tm, 128, 64, 32, 16, 8))
    tn = _pick_tile(N, (tn, 256, 128))
    tk = _pick_tile(K, (tk, 256, 128))
    if fuse_rope and tn % head_dim != 0:
        tn = head_dim
    grid = (M // tm, N // tn, K // tk)

    sel = (indicators == 1).astype(x.dtype).reshape(M, 1)
    # Per-row-tile expert usage flags (scalar prefetch).  With the real mPLUG-Owl2
    # layout (contiguous vision-token block) most tiles are single-expert.
    ind_tiles = indicators.reshape(M // tm, tm)
    need0 = jnp.any(ind_tiles != 1, axis=1).astype(jnp.int32)
    need1 = jnp.any(ind_tiles == 1, axis=1).astype(jnp.int32)
    # TODO(synk): full MoE-style token grouping (sorted tokens + group offsets in the
    # lhs index_map) would also remove the second weight stream for mixed tiles.

    cost = pl.CostEstimate(
        flops=4 * M * K * N, transcendentals=0,
        bytes_accessed=(M * K + 2 * K * N + M * N) * x.dtype.itemsize)

    in_specs = [
        pl.BlockSpec((tm, tk), lambda i, j, k, n0, n1: (i, k)),
        pl.BlockSpec((tm, 1), lambda i, j, k, n0, n1: (i, 0)),
        pl.BlockSpec((tk, tn), lambda i, j, k, n0, n1: (k, j)),
        pl.BlockSpec((tk, tn), lambda i, j, k, n0, n1: (k, j)),
    ]
    args = [sel, w0_t, w1_t]
    if fuse_rope:
        kernel = functools.partial(_mw_matmul_rope_kernel, head_dim=head_dim,
                                   out_scale=out_scale)
        in_specs += [
            pl.BlockSpec((tm, head_dim), lambda i, j, k, n0, n1: (i, 0)),
            pl.BlockSpec((tm, head_dim), lambda i, j, k, n0, n1: (i, 0)),
        ]
        args += [cos, sin]
    else:
        kernel = _mw_matmul_kernel

    return pl.pallas_call(
        kernel,
        out_shape=jax.ShapeDtypeStruct((M, N), x.dtype),
        grid_spec=pltpu.PrefetchScalarGridSpec(
            num_scalar_prefetch=2,
            grid=grid,
            in_specs=in_specs,
            out_specs=pl.BlockSpec((tm, tn), lambda i, j, k, n0, n1: (i, j)),
            scratch_shapes=[pltpu.VMEM((tm, tn), jnp.float32)]),
        compiler_params=pltpu.CompilerParams(
            dimension_semantics=("parallel", "parallel", "arbitrary")),
        cost_estimate=cost,
    )(need0, need1, x, *args)


# ------------------------- flash attention (causal, GQA) ---------------------


def _flash_attn_kernel(q_ref, k_ref, v_ref, o_ref, m_ref, l_ref, acc_ref, *, group):
    qi = pl.program_id(2)
    ki = pl.program_id(3)
    tq = q_ref.shape[1]
    tkv = k_ref.shape[1]
    hd = k_ref.shape[2]

    @pl.when(ki == 0)
    def _init():
        m_ref[...] = jnp.full(m_ref.shape, MASK_VALUE, jnp.float32)
        l_ref[...] = jnp.zeros_like(l_ref)
        acc_ref[...] = jnp.zeros_like(acc_ref)

    q_first = qi * tq
    q_last = q_first + tq - 1
    kv_first = ki * tkv
    kv_last = kv_first + tkv - 1

    def process(apply_mask):
        # One K/V fetch serves all `group` query heads of this KV head (GQA packing).
        q = q_ref[0]          # (tq, group*hd) bf16, pre-scaled by 1/sqrt(hd)
        k = k_ref[0]          # (tkv, hd)      bf16
        v = v_ref[0]          # (tkv, hd)      bf16
        if apply_mask:
            row = q_first + lax.broadcasted_iota(jnp.int32, (tq, tkv), 0)
            col = kv_first + lax.broadcasted_iota(jnp.int32, (tq, tkv), 1)
            keep = row >= col
        for h in range(group):
            qh = q[:, h * hd:(h + 1) * hd]
            # Contract head_dim directly (no K transpose); f32 accumulation on the MXU.
            s = lax.dot_general(qh, k, (((1,), (1,)), ((), ())),
                                preferred_element_type=jnp.float32)   # (tq, tkv)
            if apply_mask:
                s = jnp.where(keep, s, MASK_VALUE)
            m_prev = m_ref[h]
            m_new = jnp.maximum(m_prev, jnp.max(s, axis=-1, keepdims=True))
            alpha = jnp.exp(m_prev - m_new)
            p = jnp.exp(s - m_new)
            l_ref[h] = alpha * l_ref[h] + jnp.sum(p, axis=-1, keepdims=True)
            acc_ref[h] = alpha * acc_ref[h] + jnp.dot(
                p.astype(v.dtype), v, preferred_element_type=jnp.float32)
            m_ref[h] = m_new

    # Fully below the diagonal: no mask arithmetic at all.
    @pl.when(kv_last <= q_first)
    def _full():
        process(False)

    # Diagonal-straddling block: apply the in-kernel causal mask.
    @pl.when(jnp.logical_and(kv_first <= q_last, kv_last > q_first))
    def _diag():
        process(True)

    # Fully above the diagonal: nothing (K/V DMA is also skipped via the clamped
    # index_map in attention_core).

    @pl.when(ki == pl.num_programs(3) - 1)
    def _finalize():
        outs = []
        for h in range(group):
            inv_l = pl.reciprocal(l_ref[h], approx=True)
            outs.append((acc_ref[h] * inv_l).astype(o_ref.dtype))
        o_ref[0] = outs[0] if group == 1 else jnp.concatenate(outs, axis=-1)


def attention_core(q, k, v, num_heads, num_kv_heads, head_dim, *, tq=256, tkv=256):
    """Causal flash attention with GQA group packing.

    q: (B, S, num_heads*head_dim), k/v: (B, S, num_kv_heads*head_dim); token-major,
    no physical head transposes.  q must already carry the 1/sqrt(hd) scale.
    Defaults (256) target v6e/v7x's 2x256x256 MXU; pass tq=tkv=128 on v5e.
    """
    # TODO(synk): padding / arbitrary additive attention_mask and past_key_value
    # (KV cache) paths are not implemented; this is the causal no-cache forward.
    B, S, _ = q.shape
    g = num_heads // num_kv_heads
    tq = _pick_tile(S, (tq, 128, 64, 32, 16, 8))
    tkv = _pick_tile(S, (tkv, 128, 64, 32, 16, 8))
    kernel = functools.partial(_flash_attn_kernel, group=g)
    grid = (B, num_kv_heads, S // tq, S // tkv)

    def kv_index(b, h, i, j):
        # Clamp above-diagonal kv blocks to the diagonal block: the block index then
        # matches the previous grid step, so Pallas skips the DMA; compute for those
        # steps is already skipped inside the kernel.
        return (b, jnp.minimum(j, (i * tq + tq - 1) // tkv), h)

    cost = pl.CostEstimate(
        flops=4 * B * num_heads * S * S * head_dim,
        transcendentals=B * num_heads * S * S,
        bytes_accessed=(2 * q.size + k.size + v.size) * q.dtype.itemsize)

    return pl.pallas_call(
        kernel,
        out_shape=jax.ShapeDtypeStruct((B, S, num_heads * head_dim), q.dtype),
        grid_spec=pltpu.PrefetchScalarGridSpec(
            num_scalar_prefetch=0,
            grid=grid,
            in_specs=[
                pl.BlockSpec((1, tq, g * head_dim), lambda b, h, i, j: (b, i, h)),
                pl.BlockSpec((1, tkv, head_dim), kv_index),
                pl.BlockSpec((1, tkv, head_dim), kv_index),
            ],
            out_specs=pl.BlockSpec((1, tq, g * head_dim), lambda b, h, i, j: (b, i, h)),
            scratch_shapes=[
                pltpu.VMEM((g, tq, 1), jnp.float32),          # running max per head
                pltpu.VMEM((g, tq, 1), jnp.float32),          # running sum per head
                pltpu.VMEM((g, tq, head_dim), jnp.float32),   # accumulator per head
            ],
        ),
        compiler_params=pltpu.CompilerParams(
            dimension_semantics=("parallel", "parallel", "parallel", "arbitrary")),
        cost_estimate=cost,
    )(q, k, v)


# ------------------------------ RoPE (JAX glue) -------------------------------


def rope_cos_sin(position_ids, head_dim, theta):
    inv_freq = 1.0 / (theta ** (jnp.arange(0, head_dim, 2, dtype=jnp.float32) / head_dim))
    freqs = position_ids.astype(jnp.float32)[..., None] * inv_freq[None, None, :]
    emb = jnp.concatenate([freqs, freqs], axis=-1)  # (B, S, head_dim)
    return jnp.cos(emb), jnp.sin(emb)


def rotate_half(x):
    d = x.shape[-1] // 2
    return jnp.concatenate([-x[..., d:], x[..., :d]], axis=-1)


# --------------------------- LlamaAttention forward ---------------------------


def llama_attention_forward(params, hidden_states, modality_indicators,
                            position_ids, cfg):
    B, S, H = hidden_states.shape
    nh, nkv, hd = cfg["num_heads"], cfg["num_kv_heads"], cfg["head_dim"]

    x2d = hidden_states.reshape(B * S, H)
    ind = modality_indicators.reshape(B * S).astype(jnp.int32)

    cos, sin = rope_cos_sin(position_ids, hd, cfg["rope_theta"])
    cos2d = cos.reshape(B * S, hd)
    sin2d = sin.reshape(B * S, hd)

    # Projections on the MXU with RoPE fused into the writeback epilogue (q, k).
    # The softmax 1/sqrt(hd) scale is folded into q's epilogue (free), so the
    # attention kernel does no per-step score scaling.
    q = linear(x2d, params["wq"], cos=cos2d, sin=sin2d, head_dim=hd,
               out_scale=1.0 / math.sqrt(hd))                          # (B*S, nh*hd)
    k = multiway_linear(x2d, params["wk0"], params["wk1"], ind,
                        cos=cos2d, sin=sin2d, head_dim=hd)             # (B*S, nkv*hd)
    v = multiway_linear(x2d, params["wv0"], params["wv1"], ind)        # (B*S, nkv*hd)

    # Flash attention core (scores + online softmax + weighted sum) in Pallas.
    attn = attention_core(q.reshape(B, S, nh * hd), k.reshape(B, S, nkv * hd),
                          v.reshape(B, S, nkv * hd), nh, nkv, hd)      # (B, S, nh*hd)

    # Output projection (already token-major, no transpose needed).
    out = linear(attn.reshape(B * S, nh * hd), params["wo"])
    return out.reshape(B, S, H)
    # TODO(synk): past_key_value / use_cache, output_attentions, attention dropout and
    # arbitrary additive attention_mask paths are not implemented; the math above
    # matches the causal, no-cache inference path of the PyTorch module exactly.


# ----------------------------- pure-JAX reference ------------------------------


def reference_forward(params, hidden_states, modality_indicators, position_ids, cfg):
    """f32 golden reference matching the PyTorch LlamaAttention forward."""
    B, S, H = hidden_states.shape
    nh, nkv, hd = cfg["num_heads"], cfg["num_kv_heads"], cfg["head_dim"]
    g = nh // nkv
    f32 = jnp.float32

    with jax.default_matmul_precision("highest"):
        x2d = hidden_states.astype(f32).reshape(B * S, H)
        ind = modality_indicators.reshape(B * S)
        wq, wo = params["wq"].astype(f32), params["wo"].astype(f32)
        wk0, wk1 = params["wk0"].astype(f32), params["wk1"].astype(f32)
        wv0, wv1 = params["wv0"].astype(f32), params["wv1"].astype(f32)

        q = x2d @ wq
        k = jnp.where((ind == 1)[:, None], x2d @ wk1, x2d @ wk0)
        v = jnp.where((ind == 1)[:, None], x2d @ wv1, x2d @ wv0)

        q = q.reshape(B, S, nh, hd).transpose(0, 2, 1, 3)
        k = k.reshape(B, S, nkv, hd).transpose(0, 2, 1, 3)
        v = v.reshape(B, S, nkv, hd).transpose(0, 2, 1, 3)

        cos, sin = rope_cos_sin(position_ids, hd, cfg["rope_theta"])
        cos, sin = cos[:, None], sin[:, None]
        q = q * cos + rotate_half(q) * sin
        k = k * cos + rotate_half(k) * sin

        k = jnp.repeat(k, g, axis=1)
        v = jnp.repeat(v, g, axis=1)

        scores = jnp.einsum("bhqd,bhkd->bhqk", q, k) / math.sqrt(hd)
        neg = jnp.finfo(f32).min
        causal = jnp.where(jnp.tril(jnp.ones((S, S), jnp.bool_)), 0.0, neg)
        scores = scores + causal[None, None]
        p = jax.nn.softmax(scores, axis=-1)
        attn = jnp.einsum("bhqk,bhkd->bhqd", p, v)
        attn = attn.transpose(0, 2, 1, 3).reshape(B * S, nh * hd)
        out = attn @ wo
    return out.reshape(B, S, H)


# ------------------------------------ main ------------------------------------


if __name__ == "__main__":
    # LlamaConfig-like setup (hidden_size == num_heads * head_dim).  Shapes are chosen
    # small but large enough to exercise: the k-accumulation loop in the projections,
    # multiple q/kv blocks (diagonal + full + skipped causal branches, DMA clamp), and
    # GQA packing with group=2.
    cfg = dict(hidden_size=1024, num_heads=4, num_kv_heads=2, head_dim=256,
               rope_theta=10000.0)
    B, S = 2, 512
    H = cfg["hidden_size"]
    nh, nkv, hd = cfg["num_heads"], cfg["num_kv_heads"], cfg["head_dim"]
    assert nh * hd == H
    dtype = jnp.bfloat16  # bf16 MXU operands end-to-end; f32 accumulation in-kernel

    key = jax.random.PRNGKey(0)
    ks = jax.random.split(key, 8)
    wscale = 0.05
    # Weights stored pre-transposed as (in, out) so kernels compute x @ W.
    params = {
        "wq":  (wscale * jax.random.normal(ks[0], (H, nh * hd), jnp.float32)).astype(dtype),
        "wk0": (wscale * jax.random.normal(ks[1], (H, nkv * hd), jnp.float32)).astype(dtype),
        "wk1": (wscale * jax.random.normal(ks[2], (H, nkv * hd), jnp.float32)).astype(dtype),
        "wv0": (wscale * jax.random.normal(ks[3], (H, nkv * hd), jnp.float32)).astype(dtype),
        "wv1": (wscale * jax.random.normal(ks[4], (H, nkv * hd), jnp.float32)).astype(dtype),
        "wo":  (wscale * jax.random.normal(ks[5], (nh * hd, H), jnp.float32)).astype(dtype),
    }

    hidden_states = jax.random.normal(ks[6], (B, S, H), jnp.float32).astype(dtype)
    # modality indicator per token (0 = text expert, 1 = vision expert)
    modality_indicators = (jax.random.uniform(ks[7], (B, S)) > 0.5).astype(jnp.int32)
    position_ids = jnp.broadcast_to(jnp.arange(S, dtype=jnp.int32)[None, :], (B, S))

    out = llama_attention_forward(params, hidden_states, modality_indicators,
                                  position_ids, cfg)
    out = jax.block_until_ready(out)

    ref = reference_forward(params, hidden_states, modality_indicators,
                            position_ids, cfg)

    out_f32 = out.astype(jnp.float32)
    assert out.shape == (B, S, H)
    assert bool(jnp.all(jnp.isfinite(out_f32))), "non-finite output"
    assert jnp.allclose(out_f32, ref, atol=6e-2, rtol=6e-2), "mismatch vs reference"

    print("KERNEL_OK")
</pallas_src>

<mosaic_0001>
module attributes {stable_mosaic.version = 11 : i64} {
  func.func @_matmul_rope_kernel(%arg0: i32, %arg1: i32, %arg2: i32, %arg3: memref<256x512xbf16, #tpu.memory_space<vmem>>, %arg4: memref<512x256xbf16, #tpu.memory_space<vmem>>, %arg5: memref<256x256xf32, #tpu.memory_space<vmem>>, %arg6: memref<256x256xf32, #tpu.memory_space<vmem>>, %arg7: memref<256x256xbf16, #tpu.memory_space<vmem>>, %arg8: memref<256x256xf32, #tpu.memory_space<vmem>>) attributes {dimension_semantics = [#tpu.dimension_semantics<parallel>, #tpu.dimension_semantics<parallel>, #tpu.dimension_semantics<arbitrary>], iteration_bounds = array<i64: 4, 4, 2>, scalar_prefetch = 0 : i64, scratch_operands = 1 : i64, tpu.core_type = #tpu.core_type<tc>, window_params = [{transform_indices = @transform_0, window_bounds = array<i64: 256, 512>}, {transform_indices = @transform_1, window_bounds = array<i64: 512, 256>}, {transform_indices = @transform_2, window_bounds = array<i64: 256, 256>}, {transform_indices = @transform_3, window_bounds = array<i64: 256, 256>}, {transform_indices = @transform_4, window_bounds = array<i64: 256, 256>}]} {
    %c0_i32 = arith.constant 0 : i32
    %0 = arith.cmpi eq, %arg2, %c0_i32 : i32
    %1 = arith.extui %0 : i1 to i32
    %c0_i32_0 = arith.constant 0 : i32
    %2 = arith.cmpi ne, %1, %c0_i32_0 : i32
    scf.if %2 {
      %cst_9 = arith.constant 0.000000e+00 : f32
      %12 = vector.broadcast %cst_9 : f32 to vector<256x256xf32>
      %c0_10 = arith.constant 0 : index
      %c0_11 = arith.constant 0 : index
      %13 = vector.load %arg8[%c0_10, %c0_11] : memref<256x256xf32, #tpu.memory_space<vmem>>, vector<256x256xf32>
      tpu.vector_store %arg8[%c0_10, %c0_11], %12 {strides = array<i32>} : memref<256x256xf32, #tpu.memory_space<vmem>>, vector<256x256xf32>,
    } else {
    }
    %c0 = arith.constant 0 : index
    %c0_1 = arith.constant 0 : index
    %3 = vector.load %arg8[%c0, %c0_1] : memref<256x256xf32, #tpu.memory_space<vmem>>, vector<256x256xf32>
    %c0_2 = arith.constant 0 : index
    %c0_3 = arith.constant 0 : index
    %4 = vector.load %arg3[%c0_2, %c0_3] : memref<256x512xbf16, #tpu.memory_space<vmem>>, vector<256x512xbf16>
    %c0_4 = arith.constant 0 : index
    %c0_5 = arith.constant 0 : index
    %5 = vector.load %arg4[%c0_4, %c0_5] : memref<512x256xbf16, #tpu.memory_space<vmem>>, vector<512x256xbf16>
    %cst = arith.constant dense<0.000000e+00> : vector<256x256xf32>
    %6 = tpu.matmul %4, %5, %cst {dimension_numbers = #tpu.dot_dimension_numbers<[1], [0], [0], [1], [0, 0, 1, 1], [], []>} : vector<256x512xbf16>, vector<512x256xbf16>, vector<256x256xf32> -> vector<256x256xf32>
    %7 = arith.addf %3, %6 : vector<256x256xf32>
    %c0_6 = arith.constant 0 : index
    %c0_7 = arith.constant 0 : index
    %8 = vector.load %arg8[%c0_6, %c0_7] : memref<256x256xf32, #tpu.memory_space<vmem>>, vector<256x256xf32>
    tpu.vector_store %arg8[%c0_6, %c0_7], %7 {strides = array<i32>} : memref<256x256xf32, #tpu.memory_space<vmem>>, vector<256x256xf32>,
    %c1_i32 = arith.constant 1 : i32
    %9 = arith.cmpi eq, %arg2, %c1_i32 : i32
    %10 = arith.extui %9 : i1 to i32
    %c0_i32_8 = arith.constant 0 : i32
    %11 = arith.cmpi ne, %10, %c0_i32_8 : i32
    scf.if %11 {
      %c0_9 = arith.constant 0 : index
      %c0_10 = arith.constant 0 : index
      %12 = vector.load %arg8[%c0_9, %c0_10] : memref<256x256xf32, #tpu.memory_space<vmem>>, vector<256x256xf32>
      %c0_11 = arith.constant 0 : index
      %c0_12 = arith.constant 0 : index
      %13 = vector.load %arg5[%c0_11, %c0_12] : memref<256x256xf32, #tpu.memory_space<vmem>>, vector<256x256xf32>
      %c0_13 = arith.constant 0 : index
      %c0_14 = arith.constant 0 : index
      %14 = vector.load %arg6[%c0_13, %c0_14] : memref<256x256xf32, #tpu.memory_space<vmem>>, vector<256x256xf32>
      %15 = tpu.iota {dimensions = array<i32: 1>} : vector<1x256xi32>
      %c128_i32 = arith.constant 128 : i32
      %16 = vector.broadcast %c128_i32 : i32 to vector<1x256xi32>
      %17 = arith.cmpi slt, %15, %16 : vector<1x256xi32>
      %cst_15 = arith.constant -1.000000e+00 : f32
      %cst_16 = arith.constant 1.000000e+00 : f32
      %18 = vector.broadcast %cst_15 : f32 to vector<1x256xf32>
      %19 = vector.broadcast %cst_16 : f32 to vector<1x256xf32>
      %20 = arith.select %17, %18, %19 : vector<1x256xi1>, vector<1x256xf32>
      %c128_i32_17 = arith.constant 128 : i32
      %21 = tpu.dynamic_rotate %12 by %c128_i32_17 dim 1 : vector<256x256xf32>, i32 -> vector<256x256xf32>
      %22 = vector.broadcast %20 : vector<1x256xf32> to vector<256x256xf32>
      %23 = arith.mulf %21, %22 : vector<256x256xf32>
      %24 = arith.mulf %12, %13 : vector<256x256xf32>
      %25 = arith.mulf %23, %14 : vector<256x256xf32>
      %26 = arith.addf %24, %25 : vector<256x256xf32>
      %cst_18 = arith.constant 6.250000e-02 : f32
      %27 = vector.broadcast %cst_18 : f32 to vector<256x256xf32>
      %28 = arith.mulf %26, %27 : vector<256x256xf32>
      %29 = arith.truncf %28 : vector<256x256xf32> to vector<256x256xbf16>
      %c0_19 = arith.constant 0 : index
      %c0_20 = arith.constant 0 : index
      %30 = vector.load %arg7[%c0_19, %c0_20] : memref<256x256xbf16, #tpu.memory_space<vmem>>, vector<256x256xbf16>
      tpu.vector_store %arg7[%c0_19, %c0_20], %29 {strides = array<i32>} : memref<256x256xbf16, #tpu.memory_space<vmem>>, vector<256x256xbf16>,
    } else {
    }
    return
  }
  func.func @transform_0(%arg0: i32, %arg1: i32, %arg2: i32) -> (i32, i32) {
    %c0_i32 = arith.constant 0 : i32
    return %arg0, %arg2 : i32, i32
  }
  func.func @transform_1(%arg0: i32, %arg1: i32, %arg2: i32) -> (i32, i32) {
    %c0_i32 = arith.constant 0 : i32
    return %arg2, %arg1 : i32, i32
  }
  func.func @transform_2(%arg0: i32, %arg1: i32, %arg2: i32) -> (i32, i32) {
    %c0_i32 = arith.constant 0 : i32
    %c0_i32_0 = arith.constant 0 : i32
    return %arg0, %c0_i32 : i32, i32
  }
  func.func @transform_3(%arg0: i32, %arg1: i32, %arg2: i32) -> (i32, i32) {
    %c0_i32 = arith.constant 0 : i32
    %c0_i32_0 = arith.constant 0 : i32
    return %arg0, %c0_i32 : i32, i32
  }
  func.func @transform_4(%arg0: i32, %arg1: i32, %arg2: i32) -> (i32, i32) {
    %c0_i32 = arith.constant 0 : i32
    return %arg0, %arg1 : i32, i32
  }
}

</mosaic_0001>

<bundles_post_ra>
// kernel: tpu_custom_call.1
= control target key start
LH: loop header
LB: loop body
LE: loop exit
PB: predicated region body
PF: predicated region fallthrough
CT: control target
= control target key end

     0   :  { %s4658_s0 = inlined_call_operand.hbm [shape: bf16[1024,1024], index: 0, kind: input, shape index: {}]   ;;  %s4659_s1 = inlined_call_operand.hbm [shape: bf16[1024,1024], index: 1, kind: input, shape index: {}]   ;;  %s4660_s2 = inlined_call_operand.hbm [shape: f32[1024,256], index: 2, kind: input, shape index: {}]   ;;  %s4661_s3 = inlined_call_operand.hbm [shape: f32[1024,256], index: 3, kind: input, shape index: {}]   ;;  %s4662_s4 = inlined_call_operand.hbm [shape: bf16[1024,1024], index: 4, kind: output, shape index: {}]  }
   0x1   :  { %4692 = sst [smem:[#allocation35_spill]] %s4658_s0 }
   0x2   :  { %4693 = sst [smem:[#allocation36_spill]] %s4659_s1 }
   0x3   :  { %4694 = sst [smem:[#allocation37_spill]] %s4660_s2 }
   0x4   :  { %4695 = sst [smem:[#allocation38_spill]] %s4661_s3 }
   0x5   :  { %4696 = sst [smem:[#allocation39_spill]] %s4662_s4 }
   0x6   :  { %9 = vsyncpa [#allocation4], 0 }
   0x7   :  { %11 = vsyncpa [#allocation4 + $0x1], 0 }
   0x8   :  { %12 = vsyncpa [#allocation7], 0 }
   0x9   :  { %14 = vsyncpa [#allocation7 + $0x1], 0 }
   0xa   :  { %15 = vsyncpa [#allocation10], 0 }
   0xb   :  { %17 = vsyncpa [#allocation10 + $0x1], 0 }
   0xc   :  { %18 = vsyncpa [#allocation5], 0 }
   0xd   :  { %20 = vsyncpa [#allocation5 + $0x1], 0  ;;  %s3758_s15 = smov 0   ;;  %s3760_s16 = smov 0  }
   0xe   :  { %s3762_s17 = smov 0   ;;  %s3764_s18 = smov 0  }
   0xf   :  { %s3766_s19 = smov 0   ;;  %s3768_s20 = smov 0  }
  0x10   :  { %s3770_s21 = smov 0   ;;  %s3772_s22 = smov 0  }
  0x11   :  { %s3774_s23 = smov 0   ;;  %s3776_s24 = smov 0  }
  0x12   :  { %s3778_s25 = smov 0   ;;  %s3780_s26 = smov 0  }
  0x13   :  { %s3782_s27 = smov 0   ;;  %s3784_s28 = smov 0  }
  0x14   :  { %s3786_s29 = smov 0   ;;  %s3788_s30 = smov 0  }
  0x15   :  { %s3790_s5 = smov 0   ;;  %s3792_s6 = smov 0  }
  0x16   :  { %s3794_s7 = smov 0  }
  0x17 LB: > { %4697 = sst [smem:[#allocation17_spill]] %s3645_s15  ;;  %s3854_s8 = sadd.s32 4294967295, %s3717_s7   ;;  %s3717_s7 = sphi %s3794_s7, %s26_s7   ;;  %s3713_s6 = sphi %s3792_s6, %s4781_s6   ;;  %s3709_s5 = sphi %s3790_s5, %s4768_s5   ;;  %s3705_s30 = sphi %s3788_s30, %s4780_s30   ;;  %s3701_s29 = sphi %s3786_s29, %s4779_s29   ;;  %s3697_s28 = sphi %s3784_s28, %s4766_s28   ;;  %s3693_s27 = sphi %s3782_s27, %s4778_s27   ;;  %s3689_s26 = sphi %s3780_s26, %s4777_s26   ;;  %s3685_s25 = sphi %s3778_s25, %s4776_s25   ;;  %s3681_s24 = sphi %s3776_s24, %s4775_s24   ;;  %s3677_s23 = sphi %s3774_s23, %s4764_s23   ;;  %s3673_s22 = sphi %s3772_s22, %s4763_s22   ;;  %s3669_s21 = sphi %s3770_s21, %s4762_s21   ;;  %s3665_s20 = sphi %s3768_s20, %s4774_s20   ;;  %s3661_s19 = sphi %s3766_s19, %s4773_s19   ;;  %s3657_s18 = sphi %s3764_s18, %s4761_s18   ;;  %s3653_s17 = sphi %s3762_s17, %s4771_s17   ;;  %s3649_s16 = sphi %s3760_s16, %s4769_s16   ;;  %s3645_s15 = sphi %s3758_s15, %s4760_s15  }
  0x18   : > { %4698 = sst [smem:[#allocation18_spill]] %s3649_s16  ;;  %s2718_s9 = sadd.s32 4294967294, %s3717_s7  }
  0x19   : > { %4699 = sst [smem:[#allocation19_spill]] %s3657_s18  ;;  %s38_s10 = sadd.s32 1, %s3705_s30 }
  0x1a   : > { %4700 = sst [smem:[#allocation20_spill]] %s3661_s19  ;;  %s41_s11 = sadd.s32 1, %s3709_s5 }
  0x1b   : > { %4701 = sst [smem:[#allocation21_spill]] %s3673_s22  ;;  %p39_p0 = scmp.ge.s32.totalorder %s38_s10, 2 }
  0x1c   : > { %4702 = sst [smem:[#allocation22_spill]] %s3677_s23  ;;  %p4679_p1 = scmp.eq.s32.totalorder %s3717_s7, 0 }
  0x1d   : > { %4703 = sst [smem:[#allocation23_spill]] %s3693_s27  ;;  %p4678_p2 = scmp.eq.s32.totalorder %s3854_s8, 0 }
  0x1e   : > { %4704 = sst [smem:[#allocation24_spill]] %s3697_s28  ;;  %s82_s12 = sadd.s32 1, %s3677_s23 }
  0x1f   : > { %4705 = sst [smem:[#allocation25_spill]] %s3701_s29  ;;  %s4783_s10 = smov (%p39_p0, %s38_s10), 0 }
  0x20   : > { %4706 = sst [smem:[#allocation26_spill]] %s3709_s5  ;;  %s4785_s11 = smov (!%p39_p0, %s41_s11), %s3709_s5 }
  0x21   : > { %4707 = sst [smem:[#allocation27_spill]] %s4783_s10  ;;  %s3869_s13 = ssub.s32 %s3705_s30, %s4783_s10 }
  0x22   : > { %p89_p3 = scmp.ne.s32.totalorder %s3677_s23, %s3673_s22  ;;  %p4680_p4 = scmp.ge.s32.totalorder %s4785_s11, 4 }
  0x23   : > { %p95_p5 = scmp.ne.s32.totalorder %s3673_s22, %s3669_s21  ;;  %p172_p7 = scmp.ne.s32.totalorder %s3653_s17, %s3649_s16 }
  0x24   : > { %p3878_p6 = por %p89_p3, %p4679_p1  ;;  %p173_p9 = scmp.eq.s32.totalorder %s3854_s8, 31 }
  0x25   : > { %s3887_s4 = scalar_select %p4680_p4, 0, %s4785_s11  }
  0x26   : > { %p3891_p8 = por %p95_p5, %p4678_p2  ;;  %p178_p10 = scmp.ne.s32.totalorder %s3649_s16, %s3645_s15 }
  0x27   : > { %4709 = sst [smem:[#allocation28_spill]] %s3887_s4  ;;  %s3898_s21 = ssub.s32 %s3709_s5, %s3887_s4 }
  0x28   : > { %s4710_s10 = scalar_select %p3891_p8, 1, 0 }
  0x29   : > { %s79_s29 = sor.u32 %s3898_s21, %s3869_s13  ;;  %p3904_p11 = por %p173_p9, %p172_p7 }
  0x2a   : > { %4711 = sst [smem:[#allocation29_spill]] %s4710_s10  ;;  %p80_p12 = scmp.eq.s32.totalorder %s79_s29, 0 }
  0x2b   : > { %s4712_s28 = scalar_select %p3904_p11, 1, 0 }
  0x2c   : > { %p179_p13 = scmp.eq.s32.totalorder %s2718_s9, 31  ;;  %p4677_p0 = scmp.lt.s32.totalorder %s3717_s7, 32 }
  0x2d   : > { %4713 = sst [smem:[#allocation30_spill]] %s4712_s28  ;;  %s223_s4 = sand.u32 1, %s3717_s7  }
  0x2e   : > { %s3910_s27 = scalar_select %p80_p12, %s3677_s23, %s82_s12  }
  0x2f   : > { %p3912_p3 = por %p179_p13, %p178_p10  ;;  %s225_s10 = sand.u32 1, %s3677_s23  }
  0x30   : > { %4714 = sst [smem:[#allocation31_spill]] %s3910_s27  ;;  %s2726_s3 = sshll.u32 %s225_s10, 9 }
  0x31   : > { %s4715_s22 = scalar_select %p3912_p3, 1, 0 }
  0x32   : > { %s2728_s15 = sshll.u32 %s3709_s5, 1  ;;  %s2915_s16 = sshll.u32 %s3705_s30, 9 }
  0x33   : > { %4716 = sst [smem:[#allocation32_spill]] %s4715_s22  ;;  %s227_s2 = scalar_lea.vmem [#allocation6], %s2726_s3 }
  0x34   : > { %s237_s18 = sshll.u32 %s227_s2, 4  ;;  %s234_s19 = sadd.s32 %s2915_s16, %s2728_s15  ;;  %s3920_s18 = int_to_ptr.vmem [resolvable:$true] %s237_s18 }
  0x35   : > { %s2730_s28 = sshll.u32 %s234_s19, 6  ;;  %p3926_p5 = pnand %p4677_p0, %p3878_p6 }
  0x36   : > { %s4718_s1 = sld [smem:[#allocation36_spill]]  ;;  %s3935_s2 = scalar_lea.sflag [#allocation7], %s223_s4 }
  0x37   : > { %p3401_p6 = pneg %p3926_p5 }
  0x3c   : > { %s3933_s10 = scalar_lea.hbm %s4718_s1, %s2730_s28  ;;  %s3404_s19 = scalar_lea.hbm %s4718_s1, 65536 }
  0x3d   : > { %s3399_s3 = scalar_lea.hbm %s3933_s10, 8192  ;;  %p3405_p12 = scmp.lt.u32.totalorder %s3933_s10, %s4718_s1 }
  0x3e   : > { %p3400_p7 = scmp.ne.s32.totalorder %s3933_s10, %s3399_s3  ;;  %p3406_p13 = scmp.lt.u32.totalorder %s3404_s19, %s3399_s3 }
  0x3f   : > { %p3408_p2 = scmp.lt.u32.totalorder %s3399_s3, %s3933_s10 }
  0x40   : > { %p3402_p9 = pnand %p3401_p6, %p3400_p7  ;;  %p3407_p0 = por %p3406_p13, %p3405_p12 }
  0x42   : > { %p3403_p10 = pneg %p3402_p9  ;;  %p3409_p1 = por %p3408_p2, %p3407_p0 }
  0x44   : > { %p3410_p4 = pnand %p3409_p1, %p3403_p10 }
  0x46   : > { %3413 = shalt.err (!%p3410_p4)
}
  0x47   : > { %s3414_s4 = scalar_lea.vmem %s3920_s18, 8192  ;;  %s3719_s9 = smov [#allocation6]  }
  0x48   : > { %p3415_p7 = scmp.ne.s32.totalorder %s3920_s18, %s3414_s4  ;;  %s3419_s12 = sshll.u32 %s3719_s9, 4  ;;  %s3420_s12 = int_to_ptr.vmem [resolvable:$false] %s3419_s12 }
  0x49   : > { %s3421_s15 = scalar_lea.vmem %s3420_s12, 16384  ;;  %p3422_p11 = scmp.lt.s32.totalorder %s3920_s18, %s3420_s12 }
  0x4a   : > { %p3417_p9 = pnand %p3415_p7, %p3401_p6  ;;  %p3423_p12 = scmp.lt.s32.totalorder %s3421_s15, %s3414_s4 }
  0x4c   : > { %p3418_p3 = pneg %p3417_p9  ;;  %p3424_p13 = por %p3423_p12, %p3422_p11 }
  0x4e   : > { %p3425_p2 = pnand %p3424_p13, %p3418_p3 }
  0x50   : > { %3428 = shalt.err (!%p3425_p2)
}
  0x51   : > { %s4682_s3 = smov 512   ;;  %s3721_s16 = smov 128  }
  0x52   : > { %s3722_s19 = smov 8   ;;  %p2739_p1 = scmp.ge.s32.totalorder %s3717_s7, 1 }
  0x53   : > { %3033 = dma.hbm_to_vmem [thread:$0]  (!%p3926_p5), %s3933_s10, 8192, %s3920_s18, %s3935_s2, %s4682_s3, %s3721_s16, %s3722_s19  }
  0x54   : > { %p289_p4 = scmp.lt.s32.totalorder %s3717_s7, 33  ;;  %s45_s14 = sadd.s32 1, %s3713_s6 }
  0x55   : > { %p4720_p0 = scmp.ge.s32.totalorder %s4785_s11, 4  ;;  %s54_s4 = sadd.s32 1, %s3689_s26 }
  0x56   : > { %p3966_p11 = pnand %p2739_p1, %p289_p4  ;;  %p61_p3 = scmp.ne.s32.totalorder %s3689_s26, %s3685_s25 }
  0x57   : > { %s4787_s14 = smov (!%p4720_p0, %s45_s14), %s3713_s6  ;;  %p67_p10 = scmp.ne.s32.totalorder %s3685_s25, %s3681_s24 }
  0x58   : > { %p47_p6 = scmp.ge.s32.totalorder %s4787_s14, 4  ;;  %p4721_p5 = scmp.eq.s32.totalorder %s3717_s7, 0 }
  0x59   : > { %s162_s29 = sadd.s32 1, %s3653_s17  ;;  %p4724_p9 = scmp.eq.s32.totalorder %s3854_s8, 0 }
  0x5a   : > { %p3981_p7 = por %p4721_p5, %p61_p3  ;;  %s4789_s14 = smov (%p47_p6, %s4787_s14), 0 }
  0x5b   : > { %4723 = sst [smem:[#allocation33_spill]] %s4789_s14  ;;  %p3990_p12 = por %p4724_p9, %p67_p10 }
  0x5c   : > { %s199_s10 = sand.u32 1, %s3689_s26   ;;  %s3997_s9 = ssub.s32 %s3713_s6, %s4789_s14 }
  0x5d   : > { %s4725_s11 = scalar_select %p3990_p12, 1, 0 }
  0x5e   : > { %s51_s24 = sor.u32 %s3869_s13, %s3997_s9  ;;  %s159_s12 = sor.u32 %s3898_s21, %s3997_s9 }
  0x5f   : > { %4726 = sst [smem:[#allocation34_spill]] %s4725_s11  ;;  %p52_p13 = scmp.eq.s32.totalorder %s51_s24, 0 }
  0x60   : > { %p160_p2 = scmp.eq.s32.totalorder %s159_s12, 0  ;;  %s2721_s15 = sshll.u32 %s199_s10, 9 }
  0x61   : > { %s2723_s16 = sshll.u32 %s3705_s30, 2  ;;  %s2914_s1 = sshll.u32 %s3713_s6, 8 }
  0x62   : > { %s4005_s19 = scalar_select %p52_p13, %s3689_s26, %s54_s4  }
  0x63   : > { %s4008_s3 = scalar_select %p160_p2, %s3653_s17, %s162_s29  }
  0x64   : > { %s210_s5 = sadd.s32 %s2914_s1, %s2723_s16  ;;  %s203_s27 = scalar_lea.vmem [#allocation3], %s2721_s15 }
  0x65   : > { %s213_s23 = sshll.u32 %s203_s27, 4  ;;  %s2725_s14 = sshll.u32 %s210_s5, 6  ;;  %s4011_s23 = int_to_ptr.vmem [resolvable:$true] %s213_s23 }
  0x66   : > { %s4727_s0 = sld [smem:[#allocation35_spill]]  ;;  %p4728_p1 = scmp.lt.s32.totalorder %s3717_s7, 32 }
  0x67   : > { %s4026_s1 = scalar_lea.sflag [#allocation4], %s199_s10 }
  0x68   : > { %p4022_p4 = pnand %p4728_p1, %p3981_p7 }
  0x6a   : > { %p3431_p3 = pneg %p4022_p4 }
  0x6c   : > { %s4016_s13 = scalar_lea.hbm %s4727_s0, %s2725_s14  ;;  %s3434_s14 = scalar_lea.hbm %s4727_s0, 65536 }
  0x6d   : > { %s3429_s27 = scalar_lea.hbm %s4016_s13, 8192  ;;  %p3435_p5 = scmp.lt.u32.totalorder %s4016_s13, %s4727_s0 }
  0x6e   : > { %p3430_p0 = scmp.ne.s32.totalorder %s4016_s13, %s3429_s27  ;;  %p3436_p7 = scmp.lt.u32.totalorder %s3434_s14, %s3429_s27 }
  0x6f   : > { %p3438_p13 = scmp.lt.u32.totalorder %s3429_s27, %s4016_s13 }
  0x70   : > { %p3432_p6 = pnand %p3431_p3, %p3430_p0  ;;  %p3437_p9 = por %p3436_p7, %p3435_p5 }
  0x72   : > { %p3433_p10 = pneg %p3432_p6  ;;  %p3439_p2 = por %p3438_p13, %p3437_p9 }
  0x74   : > { %p3440_p1 = pnand %p3439_p2, %p3433_p10 }
  0x76   : > { %3443 = shalt.err (!%p3440_p1)
}
  0x77   : > { %s3444_s29 = scalar_lea.vmem %s4011_s23, 8192  ;;  %s3723_s11 = smov [#allocation3]  }
  0x78   : > { %p3445_p0 = scmp.ne.s32.totalorder %s4011_s23, %s3444_s29  ;;  %s3449_s10 = sshll.u32 %s3723_s11, 4  ;;  %s3450_s10 = int_to_ptr.vmem [resolvable:$false] %s3449_s10 }
  0x79   : > { %s3451_s24 = scalar_lea.vmem %s3450_s10, 16384  ;;  %p3452_p12 = scmp.lt.s32.totalorder %s4011_s23, %s3450_s10 }
  0x7a   : > { %p3447_p6 = pnand %p3445_p0, %p3431_p3  ;;  %p3453_p5 = scmp.lt.s32.totalorder %s3451_s24, %s3444_s29 }
  0x7c   : > { %p3448_p8 = pneg %p3447_p6  ;;  %p3454_p7 = por %p3453_p5, %p3452_p12 }
  0x7e   : > { %p3455_p9 = pnand %p3454_p7, %p3448_p8 }
  0x80   : > { %3458 = shalt.err (!%p3455_p9)
}
  0x81   : > { %s3724_s12 = smov 256   ;;  %s4730_s15 = sld [smem:[#allocation20_spill]] }
  0x82   : > { %s4731_s16 = sld [smem:[#allocation19_spill]]  ;;  %s3725_s27 = smov 16  }
  0x83   : > { %s4732_s22 = smov 512   ;;  %p106_p8 = scmp.eq.s32.totalorder %s3997_s9, 0 }
  0x84   : > { %3030 = dma.hbm_to_vmem [thread:$0]  (!%p4022_p4), %s4016_s13, 8192, %s4011_s23, %s4026_s1, %s4732_s22, %s3724_s12, %s3725_s27  }
  0x85   : > { %s108_s5 = sadd.s32 1, %s3665_s20  ;;  %p4733_p3 = scmp.eq.s32.totalorder %s3717_s7, 0 }
  0x86   : > { %s4062_s14 = scalar_select %p106_p8, %s3665_s20, %s108_s5  }
  0x87   : > { %p115_p12 = scmp.ne.s32.totalorder %s3665_s20, %s4730_s15  ;;  %s249_s4 = sand.u32 1, %s3665_s20  }
  0x88   : > { %p121_p13 = scmp.ne.s32.totalorder %s4730_s15, %s4731_s16  ;;  %s2917_s18 = sshll.u32 %s3713_s6, 13 }
  0x89   : > { %p117_p10 = por %p115_p12, %p4733_p3  ;;  %p4734_p2 = scmp.eq.s32.totalorder %s3854_s8, 0 }
  0x8a   : > { %s4078_s21 = sshll.u32 %s249_s4, 9  ;;  %s4736_s13 = sld [smem:[#allocation37_spill]] }
  0x8b   : > { %p4072_p1 = por %p121_p13, %p4734_p2  ;;  %s251_s11 = scalar_lea.vmem [#allocation8], %s4078_s21 }
  0x8c   : > { %s259_s10 = sshll.u32 %s251_s11, 4  ;;  %p4737_p4 = scmp.lt.s32.totalorder %s3717_s7, 32  ;;  %s4094_s10 = int_to_ptr.vmem [resolvable:$true] %s259_s10 }
  0x8d   : > { %s4735_s29 = scalar_select %p4072_p1, 1, 0 }
  0x8e   : > { %p4090_p0 = pnand %p4737_p4, %p117_p10 }
  0x90   : > { %s4085_s1 = scalar_lea.hbm %s4736_s13, %s2917_s18  ;;  %p3461_p5 = pneg %p4090_p0 }
  0x91   : > { %s3459_s15 = scalar_lea.hbm %s4085_s1, 8192  ;;  %s3464_s5 = scalar_lea.hbm %s4736_s13, 32768 }
  0x92   : > { %p3460_p6 = scmp.ne.s32.totalorder %s4085_s1, %s3459_s15  ;;  %p3465_p8 = scmp.lt.u32.totalorder %s4085_s1, %s4736_s13 }
  0x93   : > { %p3466_p12 = scmp.lt.u32.totalorder %s3464_s5, %s3459_s15  ;;  %p3468_p10 = scmp.lt.u32.totalorder %s3459_s15, %s4085_s1 }
  0x94   : > { %p3462_p7 = pnand %p3461_p5, %p3460_p6 }
  0x95   : > { %p3467_p3 = por %p3466_p12, %p3465_p8 }
  0x96   : > { %p3463_p9 = pneg %p3462_p7 }
  0x97   : > { %p3469_p13 = por %p3468_p10, %p3467_p3 }
  0x99   : > { %p3470_p2 = pnand %p3469_p13, %p3463_p9 }
  0x9b   : > { %3473 = shalt.err (!%p3470_p2)
}
  0x9c   : > { %s3474_s11 = scalar_lea.vmem %s4094_s10, 8192  ;;  %s3726_s16 = smov [#allocation8]  }
  0x9d   : > { %p3475_p4 = scmp.ne.s32.totalorder %s4094_s10, %s3474_s11  ;;  %s3479_s22 = sshll.u32 %s3726_s16, 4  ;;  %s3480_s22 = int_to_ptr.vmem [resolvable:$false] %s3479_s22 }
  0x9e   : > { %s3481_s23 = scalar_lea.vmem %s3480_s22, 16384  ;;  %p3482_p1 = scmp.lt.s32.totalorder %s4094_s10, %s3480_s22 }
  0x9f   : > { %p3477_p6 = pnand %p3475_p4, %p3461_p5  ;;  %p3483_p8 = scmp.lt.s32.totalorder %s3481_s23, %s3474_s11 }
  0xa1   : > { %p3478_p7 = pneg %p3477_p6  ;;  %p3484_p12 = por %p3483_p8, %p3482_p1 }
  0xa3   : > { %p3485_p3 = pnand %p3484_p12, %p3478_p7 }
  0xa5   : > { %3488 = shalt.err (!%p3485_p3)
}
  0xa6   : > { %3036 = dma.hbm_to_vmem [thread:$0]  (!%p4090_p0), %s4085_s1, 8192, %s4094_s10, %s3935_s2, %s3724_s12, %s3724_s12, %s3725_s27  }
  0xa7   : > { %s4739_s9 = sld [smem:[#allocation38_spill]]  ;;  %s273_s16 = scalar_lea.vmem [#allocation9], %s4078_s21 }
  0xa8   : > { %s281_s22 = sshll.u32 %s273_s16, 4  ;;  %s4137_s23 = scalar_lea.sflag [#allocation10], %s249_s4  ;;  %s4133_s22 = int_to_ptr.vmem [resolvable:$true] %s281_s22 }
  0xad   : > { %s4130_s11 = scalar_lea.hbm %s4739_s9, %s2917_s18  ;;  %s3494_s1 = scalar_lea.hbm %s4739_s9, 32768 }
  0xae   : > { %s3489_s0 = scalar_lea.hbm %s4130_s11, 8192  ;;  %p3495_p13 = scmp.lt.u32.totalorder %s4130_s11, %s4739_s9 }
  0xaf   : > { %p3490_p1 = scmp.ne.s32.totalorder %s4130_s11, %s3489_s0  ;;  %p3496_p2 = scmp.lt.u32.totalorder %s3494_s1, %s3489_s0 }
  0xb0   : > { %p3498_p6 = scmp.lt.u32.totalorder %s3489_s0, %s4130_s11 }
  0xb1   : > { %p3492_p9 = pnand %p3490_p1, %p3461_p5  ;;  %p3497_p4 = por %p3496_p2, %p3495_p13 }
  0xb3   : > { %p3493_p10 = pneg %p3492_p9  ;;  %p3499_p7 = por %p3498_p6, %p3497_p4 }
  0xb5   : > { %p3500_p8 = pnand %p3499_p7, %p3493_p10 }
  0xb7   : > { %3503 = shalt.err (!%p3500_p8)
}
  0xb8   : > { %s3504_s4 = scalar_lea.vmem %s4133_s22, 8192  ;;  %s3727_s21 = smov [#allocation9]  }
  0xb9   : > { %p3505_p12 = scmp.ne.s32.totalorder %s4133_s22, %s3504_s4  ;;  %s3509_s5 = sshll.u32 %s3727_s21, 4  ;;  %s3510_s5 = int_to_ptr.vmem [resolvable:$false] %s3509_s5 }
  0xba   : > { %s3511_s16 = scalar_lea.vmem %s3510_s5, 16384  ;;  %p3512_p9 = scmp.lt.s32.totalorder %s4133_s22, %s3510_s5 }
  0xbb   : > { %p3507_p3 = pnand %p3505_p12, %p3461_p5  ;;  %p3513_p13 = scmp.lt.s32.totalorder %s3511_s16, %s3504_s4 }
  0xbd   : > { %p3508_p1 = pneg %p3507_p3  ;;  %p3514_p2 = por %p3513_p13, %p3512_p9 }
  0xbf   : > { %p3515_p4 = pnand %p3514_p2, %p3508_p1 }
  0xc1   : > { %3518 = shalt.err (!%p3515_p4)
}
  0xc2   : > { %3039 = dma.hbm_to_vmem [thread:$0]  (!%p4090_p0), %s4130_s11, 8192, %s4133_s22, %s4137_s23, %s3724_s12, %s3724_s12, %s3725_s27  }
  0xc3   : > { %293 = sbr.rel (%p3966_p11) target bundleno = 776 (0x308), region = 36  ;;  %s4740_s0 = sld [smem:[#allocation34_spill]] (!%p3966_p11) }
  0xc4   : > { %s295_s2 = sand.u32 (!%p3966_p11), 1, %s3685_s25  }
  0xc5   : > { %s2740_s18 = sshll.u32 (!%p3966_p11), %s295_s2, 9  ;;  %s296_s1 = scalar_lea.sflag (!%p3966_p11), [#allocation4], %s295_s2 }
  0xc6   : > { %s4169_s10 = scalar_lea.vmem (!%p3966_p11), [#allocation3], %s2740_s18 }
  0xc9   : > { %p4741_p5 = scmp.ne.s32.totalorder (!%p3966_p11), %s4740_s0, 0 }
  0xcb   : > { %3624 = dma.done.wait (%p4741_p5), %s296_s1, 8192  }
  0xcc   : > { %3626 = vsyncadd (%p4741_p5), %s296_s1, 4294959104  ;;  %s4742_s24 = sld [smem:[#allocation21_spill]]  ;;  %s4743_s15 = sld [smem:[#allocation29_spill]] }
  0xcd   : > { %s304_s4 = sand.u32 1, %s3854_s8  }
  0xce   : > { %s305_s28 = scalar_lea.sflag [#allocation7], %s304_s4 }
  0xd2   : > { %s306_s12 = sand.u32 1, %s4742_s24   ;;  %p4744_p11 = scmp.ne.s32.totalorder %s4743_s15, 0 }
  0xd3   : > { %s2741_s27 = sshll.u32 %s306_s12, 9 }
  0xd4   : > { %s4177_s11 = scalar_lea.vmem [#allocation6], %s2741_s27 }
  0xd5   : > { %3628 = dma.done.wait (%p4744_p11), %s305_s28, 8192  }
  0xd6   : > { %3630 = vsyncadd (%p4744_p11), %s305_s28, 4294959104  ;;  %s4745_s22 = sld [smem:[#allocation20_spill]]  ;;  %p4746_p0 = scmp.ne.s32.totalorder %s4735_s29, 0 }
  0xdc   : > { %s315_s23 = sand.u32 1, %s4745_s22  }
  0xdd   : > { %s2742_s21 = sshll.u32 %s315_s23, 9 }
  0xde   : > { %s4184_s5 = scalar_lea.vmem [#allocation8], %s2742_s21 }
  0xdf   : > { %3632 = dma.done.wait (%p4746_p0), %s305_s28, 8192  }
  0xe0   : > { %3634 = vsyncadd (%p4746_p0), %s305_s28, 4294959104  ;;  %s323_s8 = scalar_lea.sflag [#allocation10], %s315_s23  ;;  %s4190_s16 = scalar_lea.vmem [#allocation9], %s2742_s21 }
  0xe1   : > { %3636 = dma.done.wait (%p4746_p0), %s323_s8, 8192  }
  0xe2   : > { %3638 = vsyncadd (%p4746_p0), %s323_s8, 4294959104  ;;  %s4747_s0 = sld [smem:[#allocation18_spill]]  ;;  %s4748_s24 = sld [smem:[#allocation23_spill]] }
  0xe8   : > { %s363_s2 = sand.u32 1, %s4747_s0   ;;  %p2745_p10 = scmp.ne.s32.totalorder %s4748_s24, 0 }
  0xe9   : > { %s2744_s18 = sshll.u32 %s363_s2, 8  ;;  %v3728_v0 = vmov (!%p2745_p10), 0.0  }
  0xea   : > { %s4199_s1 = scalar_lea.vmem [#allocation11], %s2744_s18  ;;  %377 = sbr.rel (%p2745_p10) target bundleno = 266 (0x10a), region = 56  ;;  %378 = vst [vmem:[#allocation2] sm:$0xff] (!%p2745_p10), %v3728_v0  ;;  %379 = vst [vmem:[#allocation2 + $0x8] sm:$0xff] (!%p2745_p10), %v3728_v0 }
  0xeb   : > { %380 = vst [vmem:[#allocation2 + $0x10] sm:$0xff] (!%p2745_p10), %v3728_v0  ;;  %381 = vst [vmem:[#allocation2 + $0x18] sm:$0xff] (!%p2745_p10), %v3728_v0 }
  0xec   : > { %382 = vst [vmem:[#allocation2 + $0x20] sm:$0xff] (!%p2745_p10), %v3728_v0  ;;  %383 = vst [vmem:[#allocation2 + $0x28] sm:$0xff] (!%p2745_p10), %v3728_v0 }
  0xed   : > { %384 = vst [vmem:[#allocation2 + $0x30] sm:$0xff] (!%p2745_p10), %v3728_v0  ;;  %385 = vst [vmem:[#allocation2 + $0x38] sm:$0xff] (!%p2745_p10), %v3728_v0 }
  0xee   : > { %386 = vst [vmem:[#allocation2 + $0x40] sm:$0xff] (!%p2745_p10), %v3728_v0  ;;  %387 = vst [vmem:[#allocation2 + $0x48] sm:$0xff] (!%p2745_p10), %v3728_v0 }
  0xef   : > { %388 = vst [vmem:[#allocation2 + $0x50] sm:$0xff] (!%p2745_p10), %v3728_v0  ;;  %389 = vst [vmem:[#allocation2 + $0x58] sm:$0xff] (!%p2745_p10), %v3728_v0 }
  0xf0   : > { %390 = vst [vmem:[#allocation2 + $0x60] sm:$0xff] (!%p2745_p10), %v3728_v0  ;;  %391 = vst [vmem:[#allocation2 + $0x68] sm:$0xff] (!%p2745_p10), %v3728_v0 }
  0xf1   : > { %392 = vst [vmem:[#allocation2 + $0x70] sm:$0xff] %v3728_v0  ;;  %393 = vst [vmem:[#allocation2 + $0x78] sm:$0xff] %v3728_v0 }
  0xf2   : > { %394 = vst [vmem:[#allocation2 + $0x80] sm:$0xff] %v3728_v0  ;;  %395 = vst [vmem:[#allocation2 + $0x88] sm:$0xff] %v3728_v0 }
  0xf3   : > { %396 = vst [vmem:[#allocation2 + $0x90] sm:$0xff] %v3728_v0  ;;  %397 = vst [vmem:[#allocation2 + $0x98] sm:$0xff] %v3728_v0 }
  0xf4   : > { %398 = vst [vmem:[#allocation2 + $0xa0] sm:$0xff] %v3728_v0  ;;  %399 = vst [vmem:[#allocation2 + $0xa8] sm:$0xff] %v3728_v0 }
  0xf5   : > { %400 = vst [vmem:[#allocation2 + $0xb0] sm:$0xff] %v3728_v0  ;;  %401 = vst [vmem:[#allocation2 + $0xb8] sm:$0xff] %v3728_v0 }
  0xf6   : > { %402 = vst [vmem:[#allocation2 + $0xc0] sm:$0xff] %v3728_v0  ;;  %403 = vst [vmem:[#allocation2 + $0xc8] sm:$0xff] %v3728_v0 }
  0xf7   : > { %404 = vst [vmem:[#allocation2 + $0xd0] sm:$0xff] %v3728_v0  ;;  %405 = vst [vmem:[#allocation2 + $0xd8] sm:$0xff] %v3728_v0 }
  0xf8   : > { %406 = vst [vmem:[#allocation2 + $0xe0] sm:$0xff] %v3728_v0  ;;  %407 = vst [vmem:[#allocation2 + $0xe8] sm:$0xff] %v3728_v0 }
  0xf9   : > { %408 = vst [vmem:[#allocation2 + $0xf0] sm:$0xff] %v3728_v0  ;;  %409 = vst [vmem:[#allocation2 + $0xf8] sm:$0xff] %v3728_v0 }
  0xfa   : > { %410 = vst [vmem:[#allocation2 + $0x100] sm:$0xff] %v3728_v0  ;;  %411 = vst [vmem:[#allocation2 + $0x108] sm:$0xff] %v3728_v0 }
  0xfb   : > { %412 = vst [vmem:[#allocation2 + $0x110] sm:$0xff] %v3728_v0  ;;  %413 = vst [vmem:[#allocation2 + $0x118] sm:$0xff] %v3728_v0 }
  0xfc   : > { %414 = vst [vmem:[#allocation2 + $0x120] sm:$0xff] %v3728_v0  ;;  %415 = vst [vmem:[#allocation2 + $0x128] sm:$0xff] %v3728_v0 }
  0xfd   : > { %416 = vst [vmem:[#allocation2 + $0x130] sm:$0xff] %v3728_v0  ;;  %417 = vst [vmem:[#allocation2 + $0x138] sm:$0xff] %v3728_v0 }
  0xfe   : > { %418 = vst [vmem:[#allocation2 + $0x140] sm:$0xff] %v3728_v0  ;;  %419 = vst [vmem:[#allocation2 + $0x148] sm:$0xff] %v3728_v0 }
  0xff   : > { %420 = vst [vmem:[#allocation2 + $0x150] sm:$0xff] %v3728_v0  ;;  %421 = vst [vmem:[#allocation2 + $0x158] sm:$0xff] %v3728_v0 }
 0x100   : > { %422 = vst [vmem:[#allocation2 + $0x160] sm:$0xff] %v3728_v0  ;;  %423 = vst [vmem:[#allocation2 + $0x168] sm:$0xff] %v3728_v0 }
 0x101   : > { %424 = vst [vmem:[#allocation2 + $0x170] sm:$0xff] %v3728_v0  ;;  %425 = vst [vmem:[#allocation2 + $0x178] sm:$0xff] %v3728_v0 }
 0x102   : > { %426 = vst [vmem:[#allocation2 + $0x180] sm:$0xff] %v3728_v0  ;;  %427 = vst [vmem:[#allocation2 + $0x188] sm:$0xff] %v3728_v0 }
 0x103   : > { %428 = vst [vmem:[#allocation2 + $0x190] sm:$0xff] %v3728_v0  ;;  %429 = vst [vmem:[#allocation2 + $0x198] sm:$0xff] %v3728_v0 }
 0x104   : > { %430 = vst [vmem:[#allocation2 + $0x1a0] sm:$0xff] %v3728_v0  ;;  %431 = vst [vmem:[#allocation2 + $0x1a8] sm:$0xff] %v3728_v0 }
 0x105   : > { %432 = vst [vmem:[#allocation2 + $0x1b0] sm:$0xff] %v3728_v0  ;;  %433 = vst [vmem:[#allocation2 + $0x1b8] sm:$0xff] %v3728_v0 }
 0x106   : > { %434 = vst [vmem:[#allocation2 + $0x1c0] sm:$0xff] %v3728_v0  ;;  %435 = vst [vmem:[#allocation2 + $0x1c8] sm:$0xff] %v3728_v0 }
 0x107   : > { %436 = vst [vmem:[#allocation2 + $0x1d0] sm:$0xff] %v3728_v0  ;;  %437 = vst [vmem:[#allocation2 + $0x1d8] sm:$0xff] %v3728_v0 }
 0x108   : > { %438 = vst [vmem:[#allocation2 + $0x1e0] sm:$0xff] %v3728_v0  ;;  %439 = vst [vmem:[#allocation2 + $0x1e8] sm:$0xff] %v3728_v0 }
 0x109   : > { %440 = vst [vmem:[#allocation2 + $0x1f0] sm:$0xff] %v3728_v0  ;;  %441 = vst [vmem:[#allocation2 + $0x1f8] sm:$0xff] %v3728_v0 }
 0x10a PF: > { %v3207_v1 = vld [vmem:[%s4177_s11 + $0x4] ss:$8 sps:$4 sm:$0xff]   ;;  %v3211_v3 = vld [vmem:[%s4177_s11] ss:$8 sps:$4 sm:$0xff]   ;;  %v3213_v5 = vld [vmem:[%s4177_s11 + $0x14] ss:$8 sps:$4 sm:$0xff]  }
 0x10b   : > { %v3209_v2 = vld [vmem:[%s4177_s11 + $0x104] ss:$8 sps:$4 sm:$0xff]   ;;  %1274 = vmatprep.subr.bf16.mxu1 %v3207_v1  ;;  %v3212_v4 = vld [vmem:[%s4177_s11 + $0x100] ss:$8 sps:$4 sm:$0xff]   ;;  %v3215_v6 = vld [vmem:[%s4177_s11 + $0x114] ss:$8 sps:$4 sm:$0xff]  }
 0x10c   : > { %1467 = vmatprep.subr.bf16.mxu0 %v3209_v2  ;;  %1275 = vmatpush1.bf16.msra.mxu1 %v3211_v3  ;;  %v3217_v7 = vld [vmem:[%s4177_s11 + $0x10] ss:$8 sps:$4 sm:$0xff]   ;;  %v3219_v9 = vld [vmem:[%s4177_s11 + $0x24] ss:$8 sps:$4 sm:$0xff]   ;;  %v3223_v11 = vld [vmem:[%s4177_s11 + $0x20] ss:$8 sps:$4 sm:$0xff]  }
 0x10d   : > { %1468 = vmatpush1.bf16.msra.mxu0 %v3212_v4  ;;  %1276 = vmatprep.subr.bf16.mxu1 %v3213_v5  ;;  %v3218_v8 = vld [vmem:[%s4177_s11 + $0x110] ss:$8 sps:$4 sm:$0xff]   ;;  %v3221_v10 = vld [vmem:[%s4177_s11 + $0x124] ss:$8 sps:$4 sm:$0xff]   ;;  %v3224_v12 = vld [vmem:[%s4177_s11 + $0x120] ss:$8 sps:$4 sm:$0xff]  }
 0x10e   : > { %1469 = vmatprep.subr.bf16.mxu0 %v3215_v6  ;;  %v3225_v13 = vld [vmem:[%s4177_s11 + $0x34] ss:$8 sps:$4 sm:$0xff]   ;;  %v3229_v15 = vld [vmem:[%s4177_s11 + $0x30] ss:$8 sps:$4 sm:$0xff]   ;;  %v3231_v17 = vld [vmem:[%s4177_s11 + $0x44] ss:$8 sps:$4 sm:$0xff]  }
 0x10f   : > { %v3227_v14 = vld [vmem:[%s4177_s11 + $0x134] ss:$8 sps:$4 sm:$0xff]   ;;  %v3230_v16 = vld [vmem:[%s4177_s11 + $0x130] ss:$8 sps:$4 sm:$0xff]   ;;  %v3233_v18 = vld [vmem:[%s4177_s11 + $0x144] ss:$8 sps:$4 sm:$0xff]  }
 0x110   : > { %1277 = vmatpush1.bf16.msra.mxu1 %v3217_v7  ;;  %v3235_v19 = vld [vmem:[%s4177_s11 + $0x40] ss:$8 sps:$4 sm:$0xff]   ;;  %v3237_v21 = vld [vmem:[%s4177_s11 + $0x54] ss:$8 sps:$4 sm:$0xff]   ;;  %v3241_v23 = vld [vmem:[%s4177_s11 + $0x50] ss:$8 sps:$4 sm:$0xff]  }
 0x111   : > { %1470 = vmatpush1.bf16.msra.mxu0 %v3218_v8  ;;  %1278 = vmatprep.subr.bf16.mxu1 %v3219_v9  ;;  %v3236_v20 = vld [vmem:[%s4177_s11 + $0x140] ss:$8 sps:$4 sm:$0xff]   ;;  %v3239_v22 = vld [vmem:[%s4177_s11 + $0x154] ss:$8 sps:$4 sm:$0xff]   ;;  %v3242_v24 = vld [vmem:[%s4177_s11 + $0x150] ss:$8 sps:$4 sm:$0xff]  }
 0x112   : > { %1471 = vmatprep.subr.bf16.mxu0 %v3221_v10  ;;  %v3243_v25 = vld [vmem:[%s4177_s11 + $0x64] ss:$8 sps:$4 sm:$0xff]   ;;  %v3247_v27 = vld [vmem:[%s4177_s11 + $0x60] ss:$8 sps:$4 sm:$0xff]   ;;  %v3249_v29 = vld [vmem:[%s4177_s11 + $0x74] ss:$8 sps:$4 sm:$0xff]  }
 0x113   : > { %v3245_v26 = vld [vmem:[%s4177_s11 + $0x164] ss:$8 sps:$4 sm:$0xff]   ;;  %v3248_v28 = vld [vmem:[%s4177_s11 + $0x160] ss:$8 sps:$4 sm:$0xff]   ;;  %v3251_v30 = vld [vmem:[%s4177_s11 + $0x174] ss:$8 sps:$4 sm:$0xff]  }
 0x114   : > { %1279 = vmatpush1.bf16.msra.mxu1 %v3223_v11  ;;  %v3253_v31 = vld [vmem:[%s4177_s11 + $0x70] ss:$8 sps:$4 sm:$0xff]   ;;  %v3255_v33 = vld [vmem:[%s4177_s11 + $0x84] ss:$8 sps:$4 sm:$0xff]   ;;  %v3259_v35 = vld [vmem:[%s4177_s11 + $0x80] ss:$8 sps:$4 sm:$0xff]  }
 0x115   : > { %1472 = vmatpush1.bf16.msra.mxu0 %v3224_v12  ;;  %1280 = vmatprep.subr.bf16.mxu1 %v3225_v13  ;;  %v3254_v32 = vld [vmem:[%s4177_s11 + $0x170] ss:$8 sps:$4 sm:$0xff]   ;;  %v3257_v34 = vld [vmem:[%s4177_s11 + $0x184] ss:$8 sps:$4 sm:$0xff]   ;;  %v3260_v36 = vld [vmem:[%s4177_s11 + $0x180] ss:$8 sps:$4 sm:$0xff]  }
 0x116   : > { %1473 = vmatprep.subr.bf16.mxu0 %v3227_v14  ;;  %v3261_v37 = vld [vmem:[%s4177_s11 + $0x94] ss:$8 sps:$4 sm:$0xff]   ;;  %v3265_v39 = vld [vmem:[%s4177_s11 + $0x90] ss:$8 sps:$4 sm:$0xff]   ;;  %v3267_v41 = vld [vmem:[%s4177_s11 + $0xa4] ss:$8 sps:$4 sm:$0xff]  }
 0x117   : > { %v3263_v38 = vld [vmem:[%s4177_s11 + $0x194] ss:$8 sps:$4 sm:$0xff]   ;;  %v3266_v40 = vld [vmem:[%s4177_s11 + $0x190] ss:$8 sps:$4 sm:$0xff]   ;;  %v3269_v42 = vld [vmem:[%s4177_s11 + $0x1a4] ss:$8 sps:$4 sm:$0xff]  }
 0x118   : > { %1281 = vmatpush1.bf16.msra.mxu1 %v3229_v15  ;;  %v3271_v43 = vld [vmem:[%s4177_s11 + $0xa0] ss:$8 sps:$4 sm:$0xff]   ;;  %v3273_v45 = vld [vmem:[%s4177_s11 + $0xb4] ss:$8 sps:$4 sm:$0xff]   ;;  %v3277_v47 = vld [vmem:[%s4177_s11 + $0xb0] ss:$8 sps:$4 sm:$0xff]  }
 0x119   : > { %1474 = vmatpush1.bf16.msra.mxu0 %v3230_v16  ;;  %1282 = vmatprep.subr.bf16.mxu1 %v3231_v17  ;;  %v3272_v44 = vld [vmem:[%s4177_s11 + $0x1a0] ss:$8 sps:$4 sm:$0xff]   ;;  %v3275_v46 = vld [vmem:[%s4177_s11 + $0x1b4] ss:$8 sps:$4 sm:$0xff]   ;;  %v3278_v48 = vld [vmem:[%s4177_s11 + $0x1b0] ss:$8 sps:$4 sm:$0xff]  }
 0x11a   : > { %1475 = vmatprep.subr.bf16.mxu0 %v3233_v18  ;;  %v3279_v49 = vld [vmem:[%s4177_s11 + $0xc4] ss:$8 sps:$4 sm:$0xff]   ;;  %v3283_v53 = vld [vmem:[%s4177_s11 + $0xc0] ss:$8 sps:$4 sm:$0xff]   ;;  %v3285_v55 = vld [vmem:[%s4177_s11 + $0xd4] ss:$8 sps:$4 sm:$0xff]  }
 0x11b   : > { %v3305_v50 = vld [vmem:[%s4169_s10 + $0x4] ss:$16 sps:$4 sm:$0xff]   ;;  %v3308_v52 = vld [vmem:[%s4169_s10 + $0xc] ss:$16 sps:$4 sm:$0xff]   ;;  %v3284_v54 = vld [vmem:[%s4177_s11 + $0x1c0] ss:$8 sps:$4 sm:$0xff]  }
 0x11c   : > { %1283 = vmatpush1.bf16.msra.mxu1 %v3235_v19  ;;  %v3281_v51 = vld [vmem:[%s4177_s11 + $0x1c4] ss:$8 sps:$4 sm:$0xff]   ;;  %1306 = vmatprep.mubr.bf16.mxu1 %v3305_v50  ;;  %v3287_v56 = vld [vmem:[%s4177_s11 + $0x1d4] ss:$8 sps:$4 sm:$0xff]   ;;  %v3289_v57 = vld [vmem:[%s4177_s11 + $0xd0] ss:$8 sps:$4 sm:$0xff]  }
 0x11d   : > { %1476 = vmatpush1.bf16.msra.mxu0 %v3236_v20  ;;  %1284 = vmatprep.subr.bf16.mxu1 %v3237_v21  ;;  %v3290_v58 = vld [vmem:[%s4177_s11 + $0x1d0] ss:$8 sps:$4 sm:$0xff]   ;;  %v3291_v59 = vld [vmem:[%s4177_s11 + $0xe4] ss:$8 sps:$4 sm:$0xff]   ;;  %v3295_v61 = vld [vmem:[%s4177_s11 + $0xe0] ss:$8 sps:$4 sm:$0xff]  }
 0x11e   : > { %1477 = vmatprep.subr.bf16.mxu0 %v3239_v22  ;;  %1499 = vmatprep.mubr.bf16.mxu0 %v3308_v52  ;;  %v3293_v60 = vld [vmem:[%s4177_s11 + $0x1e4] ss:$8 sps:$4 sm:$0xff]   ;;  %v3296_v62 = vld [vmem:[%s4177_s11 + $0x1e0] ss:$8 sps:$4 sm:$0xff]   ;;  %v3297_v63 = vld [vmem:[%s4177_s11 + $0xf4] ss:$8 sps:$4 sm:$0xff]  }
 0x11f   : > { %v3299_v0 = vld [vmem:[%s4177_s11 + $0x1f4] ss:$8 sps:$4 sm:$0xff]   ;;  %v3301_v1 = vld [vmem:[%s4177_s11 + $0xf0] ss:$8 sps:$4 sm:$0xff]   ;;  %s4749_s29 = sld [smem:[#allocation23_spill]] }
 0x120   : > { %1285 = vmatpush1.bf16.msra.mxu1 %v3241_v23  ;;  %v3302_v2 = vld [vmem:[%s4177_s11 + $0x1f0] ss:$8 sps:$4 sm:$0xff]   ;;  %v3309_v5 = vld [vmem:[%s4169_s10 + $0x24] ss:$16 sps:$4 sm:$0xff]   ;;  %v3311_v6 = vld [vmem:[%s4169_s10 + $0x2c] ss:$16 sps:$4 sm:$0xff]  }
 0x121   : > { %1478 = vmatpush1.bf16.msra.mxu0 %v3242_v24  ;;  %1286 = vmatprep.subr.bf16.mxu1 %v3243_v25  ;;  %v3303_v3 = vld [vmem:[%s4169_s10] ss:$16 sps:$4 sm:$0xff]   ;;  %v3306_v4 = vld [vmem:[%s4169_s10 + $0x8] ss:$16 sps:$4 sm:$0xff]   ;;  %v3315_v9 = vld [vmem:[%s4169_s10 + $0x44] ss:$16 sps:$4 sm:$0xff]  }
 0x122   : > { %1479 = vmatprep.subr.bf16.mxu0 %v3245_v26  ;;  %v3313_v7 = vld [vmem:[%s4169_s10 + $0x20] ss:$16 sps:$4 sm:$0xff]   ;;  %v3314_v8 = vld [vmem:[%s4169_s10 + $0x28] ss:$16 sps:$4 sm:$0xff]   ;;  %v3317_v10 = vld [vmem:[%s4169_s10 + $0x4c] ss:$16 sps:$4 sm:$0xff]  }
 0x123   : > { %v3319_v11 = vld [vmem:[%s4169_s10 + $0x40] ss:$16 sps:$4 sm:$0xff]   ;;  %v3320_v12 = vld [vmem:[%s4169_s10 + $0x48] ss:$16 sps:$4 sm:$0xff]   ;;  %v3321_v13 = vld [vmem:[%s4169_s10 + $0x64] ss:$16 sps:$4 sm:$0xff]  }
 0x124   : > { %1287 = vmatpush1.bf16.msra.mxu1 %v3247_v27  ;;  %v3323_v14 = vld [vmem:[%s4169_s10 + $0x6c] ss:$16 sps:$4 sm:$0xff]   ;;  %v3325_v15 = vld [vmem:[%s4169_s10 + $0x60] ss:$16 sps:$4 sm:$0xff]   ;;  %v3326_v16 = vld [vmem:[%s4169_s10 + $0x68] ss:$16 sps:$4 sm:$0xff]  }
 0x125   : > { %1480 = vmatpush1.bf16.msra.mxu0 %v3248_v28  ;;  %1288 = vmatprep.subr.bf16.mxu1 %v3249_v29  ;;  %v3327_v17 = vld [vmem:[%s4169_s10 + $0x84] ss:$16 sps:$4 sm:$0xff]   ;;  %v3329_v18 = vld [vmem:[%s4169_s10 + $0x8c] ss:$16 sps:$4 sm:$0xff]   ;;  %v3331_v19 = vld [vmem:[%s4169_s10 + $0x80] ss:$16 sps:$4 sm:$0xff]  }
 0x126   : > { %1481 = vmatprep.subr.bf16.mxu0 %v3251_v30  ;;  %v3332_v20 = vld [vmem:[%s4169_s10 + $0x88] ss:$16 sps:$4 sm:$0xff]   ;;  %v3333_v21 = vld [vmem:[%s4169_s10 + $0xa4] ss:$16 sps:$4 sm:$0xff]   ;;  %v3335_v22 = vld [vmem:[%s4169_s10 + $0xac] ss:$16 sps:$4 sm:$0xff]  }
 0x127   : > { %v3337_v23 = vld [vmem:[%s4169_s10 + $0xa0] ss:$16 sps:$4 sm:$0xff]   ;;  %v3338_v24 = vld [vmem:[%s4169_s10 + $0xa8] ss:$16 sps:$4 sm:$0xff]   ;;  %v3339_v25 = vld [vmem:[%s4169_s10 + $0xc4] ss:$16 sps:$4 sm:$0xff]  }
 0x128   : > { %1289 = vmatpush1.bf16.msra.mxu1 %v3253_v31  ;;  %v3341_v26 = vld [vmem:[%s4169_s10 + $0xcc] ss:$16 sps:$4 sm:$0xff]   ;;  %v3343_v27 = vld [vmem:[%s4169_s10 + $0xc0] ss:$16 sps:$4 sm:$0xff]   ;;  %v3344_v28 = vld [vmem:[%s4169_s10 + $0xc8] ss:$16 sps:$4 sm:$0xff]  }
 0x129   : > { %1482 = vmatpush1.bf16.msra.mxu0 %v3254_v32  ;;  %1290 = vmatprep.subr.bf16.mxu1 %v3255_v33  ;;  %v3345_v29 = vld [vmem:[%s4169_s10 + $0xe4] ss:$16 sps:$4 sm:$0xff]   ;;  %v3347_v30 = vld [vmem:[%s4169_s10 + $0xec] ss:$16 sps:$4 sm:$0xff]   ;;  %v3349_v31 = vld [vmem:[%s4169_s10 + $0xe0] ss:$16 sps:$4 sm:$0xff]  }
 0x12a   : > { %1483 = vmatprep.subr.bf16.mxu0 %v3257_v34  ;;  %v3350_v32 = vld [vmem:[%s4169_s10 + $0xe8] ss:$16 sps:$4 sm:$0xff]   ;;  %v3351_v33 = vld [vmem:[%s4169_s10 + $0x104] ss:$16 sps:$4 sm:$0xff]   ;;  %v3353_v34 = vld [vmem:[%s4169_s10 + $0x10c] ss:$16 sps:$4 sm:$0xff]  }
 0x12b   : > { %v3377_v50 = vld [vmem:[%s4169_s10 + $0x18c] ss:$16 sps:$4 sm:$0xff]   ;;  %v3380_v52 = vld [vmem:[%s4169_s10 + $0x188] ss:$16 sps:$4 sm:$0xff]   ;;  %p2874_p6 = scmp.ne.s32.totalorder %s4749_s29, 1 }
 0x12c   : > { %1291 = vmatpush1.bf16.msra.mxu1 %v3259_v35  ;;  %v3355_v35 = vld [vmem:[%s4169_s10 + $0x100] ss:$16 sps:$4 sm:$0xff]  }
 0x12d   : > { %1484 = vmatpush1.bf16.msra.mxu0 %v3260_v36  ;;  %1292 = vmatprep.subr.bf16.mxu1 %v3261_v37  ;;  %v3356_v36 = vld [vmem:[%s4169_s10 + $0x108] ss:$16 sps:$4 sm:$0xff]   ;;  %v3357_v37 = vld [vmem:[%s4169_s10 + $0x124] ss:$16 sps:$4 sm:$0xff]  }
 0x12e   : > { %1485 = vmatprep.subr.bf16.mxu0 %v3263_v38  ;;  %v3359_v38 = vld [vmem:[%s4169_s10 + $0x12c] ss:$16 sps:$4 sm:$0xff]  }
 0x130   : > { %1293 = vmatpush1.bf16.msra.mxu1 %v3265_v39  ;;  %v3361_v39 = vld [vmem:[%s4169_s10 + $0x120] ss:$16 sps:$4 sm:$0xff]  }
 0x131   : > { %1486 = vmatpush1.bf16.msra.mxu0 %v3266_v40  ;;  %1294 = vmatprep.subr.bf16.mxu1 %v3267_v41  ;;  %v3362_v40 = vld [vmem:[%s4169_s10 + $0x128] ss:$16 sps:$4 sm:$0xff]   ;;  %v3363_v41 = vld [vmem:[%s4169_s10 + $0x144] ss:$16 sps:$4 sm:$0xff]  }
 0x132   : > { %1487 = vmatprep.subr.bf16.mxu0 %v3269_v42  ;;  %v3365_v42 = vld [vmem:[%s4169_s10 + $0x14c] ss:$16 sps:$4 sm:$0xff]  }
 0x134   : > { %1295 = vmatpush1.bf16.msra.mxu1 %v3271_v43  ;;  %v3367_v43 = vld [vmem:[%s4169_s10 + $0x140] ss:$16 sps:$4 sm:$0xff]  }
 0x135   : > { %1488 = vmatpush1.bf16.msra.mxu0 %v3272_v44  ;;  %1296 = vmatprep.subr.bf16.mxu1 %v3273_v45  ;;  %v3368_v44 = vld [vmem:[%s4169_s10 + $0x148] ss:$16 sps:$4 sm:$0xff]   ;;  %v3369_v45 = vld [vmem:[%s4169_s10 + $0x164] ss:$16 sps:$4 sm:$0xff]  }
 0x136   : > { %1489 = vmatprep.subr.bf16.mxu0 %v3275_v46  ;;  %v3371_v46 = vld [vmem:[%s4169_s10 + $0x16c] ss:$16 sps:$4 sm:$0xff]  }
 0x138   : > { %1297 = vmatpush1.bf16.msra.mxu1 %v3277_v47  ;;  %v3373_v47 = vld [vmem:[%s4169_s10 + $0x160] ss:$16 sps:$4 sm:$0xff]  }
 0x139   : > { %1490 = vmatpush1.bf16.msra.mxu0 %v3278_v48  ;;  %1298 = vmatprep.subr.bf16.mxu1 %v3279_v49  ;;  %v3374_v48 = vld [vmem:[%s4169_s10 + $0x168] ss:$16 sps:$4 sm:$0xff]   ;;  %v3375_v49 = vld [vmem:[%s4169_s10 + $0x184] ss:$16 sps:$4 sm:$0xff]  }
 0x13a   : > { %1491 = vmatprep.subr.bf16.mxu0 %v3281_v51  ;;  %v3379_v51 = vld [vmem:[%s4169_s10 + $0x180] ss:$16 sps:$4 sm:$0xff]  }
 0x13c   : > { %1299 = vmatpush1.bf16.msra.mxu1 %v3283_v53  ;;  %v3381_v53 = vld [vmem:[%s4169_s10 + $0x1a4] ss:$16 sps:$4 sm:$0xff]  }
 0x13d   : > { %1492 = vmatpush1.bf16.msra.mxu0 %v3284_v54  ;;  %1300 = vmatprep.subr.bf16.mxu1 %v3285_v55  ;;  %v3383_v54 = vld [vmem:[%s4169_s10 + $0x1ac] ss:$16 sps:$4 sm:$0xff]   ;;  %v3385_v55 = vld [vmem:[%s4169_s10 + $0x1a0] ss:$16 sps:$4 sm:$0xff]  }
 0x13e   : > { %1493 = vmatprep.subr.bf16.mxu0 %v3287_v56  ;;  %v3386_v56 = vld [vmem:[%s4169_s10 + $0x1a8] ss:$16 sps:$4 sm:$0xff]  }
 0x140   : > { %1301 = vmatpush1.bf16.msra.mxu1 %v3289_v57  ;;  %v3387_v57 = vld [vmem:[%s4169_s10 + $0x1c4] ss:$16 sps:$4 sm:$0xff]  }
 0x141   : > { %1494 = vmatpush1.bf16.msra.mxu0 %v3290_v58  ;;  %1302 = vmatprep.subr.bf16.mxu1 %v3291_v59  ;;  %v3389_v58 = vld [vmem:[%s4169_s10 + $0x1cc] ss:$16 sps:$4 sm:$0xff]   ;;  %v3391_v59 = vld [vmem:[%s4169_s10 + $0x1c0] ss:$16 sps:$4 sm:$0xff]  }
 0x142   : > { %1495 = vmatprep.subr.bf16.mxu0 %v3293_v60  ;;  %v3392_v60 = vld [vmem:[%s4169_s10 + $0x1c8] ss:$16 sps:$4 sm:$0xff]  }
 0x144   : > { %1303 = vmatpush1.bf16.msra.mxu1 %v3295_v61  ;;  %v3393_v61 = vld [vmem:[%s4169_s10 + $0x1e4] ss:$16 sps:$4 sm:$0xff]  }
 0x145   : > { %1496 = vmatpush1.bf16.msra.mxu0 %v3296_v62  ;;  %1304 = vmatprep.subr.bf16.mxu1 %v3297_v63  ;;  %v3395_v62 = vld [vmem:[%s4169_s10 + $0x1ec] ss:$16 sps:$4 sm:$0xff]   ;;  %v3397_v63 = vld [vmem:[%s4169_s10 + $0x1e0] ss:$16 sps:$4 sm:$0xff]  }
 0x146   : > { %1497 = vmatprep.subr.bf16.mxu0 %v3299_v0  ;;  %v3398_v0 = vld [vmem:[%s4169_s10 + $0x1e8] ss:$16 sps:$4 sm:$0xff]  }
 0x148   : > { %1305 = vmatpush1.bf16.msra.mxu1 %v3301_v1 }
 0x149   : > { %1498 = vmatpush1.bf16.msra.mxu0 %v3302_v2  ;;  %v442_v2 = vld [vmem:[#allocation2] sm:$0xff] }
 0x14b   : > { %1307 = vmatmul.mubr.bf16.vlgmr.msra.gmra.mrb[0].mxu1 %v3303_v3 }
 0x14c   : > { %1500 = vmatmul.mubr.bf16.vlgmr.msra.gmra.mrb[0].mxu0 %v3306_v4  ;;  %1316 = vmatprep.mubr.bf16.mxu1 %v3309_v5 }
 0x14d   : > { %1509 = vmatprep.mubr.bf16.mxu0 %v3311_v6  ;;  %v443_v6 = vld [vmem:[#allocation2 + $0x8] sm:$0xff] }
 0x153   : > { %1317 = vmatmul.mubr.bf16.gmra.mrb[4].mxu1 %v3313_v7 }
 0x154   : > { %1510 = vmatmul.mubr.bf16.gmra.mrb[4].mxu0 %v3314_v8  ;;  %1326 = vmatprep.mubr.bf16.mxu1 %v3315_v9 }
 0x155   : > { %1519 = vmatprep.mubr.bf16.mxu0 %v3317_v10  ;;  %v444_v10 = vld [vmem:[#allocation2 + $0x10] sm:$0xff] }
 0x15b   : > { %1327 = vmatmul.mubr.bf16.gmra.mrb[8].mxu1 %v3319_v11 }
 0x15c   : > { %1520 = vmatmul.mubr.bf16.gmra.mrb[8].mxu0 %v3320_v12  ;;  %1336 = vmatprep.mubr.bf16.mxu1 %v3321_v13 }
 0x15d   : > { %1529 = vmatprep.mubr.bf16.mxu0 %v3323_v14 }
 0x163   : > { %1337 = vmatmul.mubr.bf16.gmra.mrb[12].mxu1 %v3325_v15  ;;  %v445_v15 = vld [vmem:[#allocation2 + $0x18] sm:$0xff] }
 0x164   : > { %1530 = vmatmul.mubr.bf16.gmra.mrb[12].mxu0 %v3326_v16  ;;  %1346 = vmatprep.mubr.bf16.mxu1 %v3327_v17 }
 0x165   : > { %1539 = vmatprep.mubr.bf16.mxu0 %v3329_v18 }
 0x16b   : > { %1347 = vmatmul.mubr.bf16.gmra.mrb[16].mxu1 %v3331_v19 }
 0x16c   : > { %1540 = vmatmul.mubr.bf16.gmra.mrb[16].mxu0 %v3332_v20  ;;  %1356 = vmatprep.mubr.bf16.mxu1 %v3333_v21 }
 0x16d   : > { %1549 = vmatprep.mubr.bf16.mxu0 %v3335_v22  ;;  %v446_v22 = vld [vmem:[#allocation2 + $0x20] sm:$0xff] }
 0x173   : > { %1357 = vmatmul.mubr.bf16.gmra.mrb[20].mxu1 %v3337_v23 }
 0x174   : > { %1550 = vmatmul.mubr.bf16.gmra.mrb[20].mxu0 %v3338_v24  ;;  %1366 = vmatprep.mubr.bf16.mxu1 %v3339_v25 }
 0x175   : > { %1559 = vmatprep.mubr.bf16.mxu0 %v3341_v26  ;;  %v447_v26 = vld [vmem:[#allocation2 + $0x28] sm:$0xff] }
 0x17b   : > { %1367 = vmatmul.mubr.bf16.gmra.mrb[24].mxu1 %v3343_v27 }
 0x17c   : > { %1560 = vmatmul.mubr.bf16.gmra.mrb[24].mxu0 %v3344_v28  ;;  %1376 = vmatprep.mubr.bf16.mxu1 %v3345_v29 }
 0x17d   : > { %1569 = vmatprep.mubr.bf16.mxu0 %v3347_v30  ;;  %v448_v30 = vld [vmem:[#allocation2 + $0x30] sm:$0xff] }
 0x183   : > { %1377 = vmatmul.mubr.bf16.gmra.mrb[28].mxu1 %v3349_v31 }
 0x184   : > { %1570 = vmatmul.mubr.bf16.gmra.mrb[28].mxu0 %v3350_v32  ;;  %1386 = vmatprep.mubr.bf16.mxu1 %v3351_v33 }
 0x185   : > { %1579 = vmatprep.mubr.bf16.mxu0 %v3353_v34 }
 0x18b   : > { %1387 = vmatmul.mubr.bf16.gmra.mrb[32].mxu1 %v3355_v35  ;;  %v449_v35 = vld [vmem:[#allocation2 + $0x38] sm:$0xff] }
 0x18c   : > { %1580 = vmatmul.mubr.bf16.gmra.mrb[32].mxu0 %v3356_v36  ;;  %1396 = vmatprep.mubr.bf16.mxu1 %v3357_v37 }
 0x18d   : > { %1589 = vmatprep.mubr.bf16.mxu0 %v3359_v38 }
 0x193   : > { %1397 = vmatmul.mubr.bf16.gmra.mrb[36].mxu1 %v3361_v39 }
 0x194   : > { %1590 = vmatmul.mubr.bf16.gmra.mrb[36].mxu0 %v3362_v40  ;;  %1406 = vmatprep.mubr.bf16.mxu1 %v3363_v41 }
 0x195   : > { %1599 = vmatprep.mubr.bf16.mxu0 %v3365_v42  ;;  %v450_v42 = vld [vmem:[#allocation2 + $0x40] sm:$0xff] }
 0x19b   : > { %1407 = vmatmul.mubr.bf16.gmra.mrb[40].mxu1 %v3367_v43 }
 0x19c   : > { %1600 = vmatmul.mubr.bf16.gmra.mrb[40].mxu0 %v3368_v44  ;;  %1416 = vmatprep.mubr.bf16.mxu1 %v3369_v45 }
 0x19d   : > { %1609 = vmatprep.mubr.bf16.mxu0 %v3371_v46  ;;  %v451_v46 = vld [vmem:[#allocation2 + $0x48] sm:$0xff] }
 0x1a3   : > { %1417 = vmatmul.mubr.bf16.gmra.mrb[44].mxu1 %v3373_v47 }
 0x1a4   : > { %1610 = vmatmul.mubr.bf16.gmra.mrb[44].mxu0 %v3374_v48  ;;  %1426 = vmatprep.mubr.bf16.mxu1 %v3375_v49 }
 0x1a5   : > { %1619 = vmatprep.mubr.bf16.mxu0 %v3377_v50  ;;  %v452_v50 = vld [vmem:[#allocation2 + $0x50] sm:$0xff] }
 0x1ab   : > { %1427 = vmatmul.mubr.bf16.gmra.mrb[48].mxu1 %v3379_v51 }
 0x1ac   : > { %1620 = vmatmul.mubr.bf16.gmra.mrb[48].mxu0 %v3380_v52  ;;  %1436 = vmatprep.mubr.bf16.mxu1 %v3381_v53 }
 0x1ad   : > { %1629 = vmatprep.mubr.bf16.mxu0 %v3383_v54 }
 0x1b3   : > { %1437 = vmatmul.mubr.bf16.gmra.mrb[52].mxu1 %v3385_v55  ;;  %v453_v55 = vld [vmem:[#allocation2 + $0x58] sm:$0xff] }
 0x1b4   : > { %1630 = vmatmul.mubr.bf16.gmra.mrb[52].mxu0 %v3386_v56  ;;  %1446 = vmatprep.mubr.bf16.mxu1 %v3387_v57 }
 0x1b5   : > { %1639 = vmatprep.mubr.bf16.mxu0 %v3389_v58 }
 0x1bb   : > { %1447 = vmatmul.mubr.bf16.gmra.mrb[56].mxu1 %v3391_v59 }
 0x1bc   : > { %1640 = vmatmul.mubr.bf16.gmra.mrb[56].mxu0 %v3392_v60  ;;  %1456 = vmatprep.mubr.bf16.mxu1 %v3393_v61 }
 0x1bd   : > { %1649 = vmatprep.mubr.bf16.mxu0 %v3395_v62  ;;  %v454_v62 = vld [vmem:[#allocation2 + $0x60] sm:$0xff] }
 0x1c3   : > { %1457 = vmatmul.mubr.bf16.gmra.mrb[60].mxu1 %v3397_v63 }
 0x1c4   : > { %1650 = vmatmul.mubr.bf16.gmra.mrb[60].mxu0 %v3398_v0 }
 0x21e   : > { %v1308_v1 = vpop.f32.mrb[0].mxu1 }
 0x21f   : > { %v1501_v3 = vpop.f32.mrb[0].mxu0  ;;  %v1310_v5 = vpop.f32.mrb[1].mxu1 }
 0x220   : > { %v1502_v4 = vadd.f32 %v1501_v3, %v1308_v1  ;;  %v1503_v7 = vpop.f32.mrb[1].mxu0  ;;  %v1312_v9 = vpop.f32.mrb[2].mxu1 }
 0x221   : > { %v1504_v8 = vadd.f32 %v1503_v7, %v1310_v5  ;;  %v1505_v11 = vpop.f32.mrb[2].mxu0  ;;  %v1314_v14 = vpop.f32.mrb[3].mxu1 }
 0x222   : > { %v1660_v12 = vadd.f32 %v1502_v4, %v442_v2  ;;  %v1506_v13 = vadd.f32 %v1505_v11, %v1312_v9  ;;  %v1507_v16 = vpop.f32.mrb[3].mxu0  ;;  %v455_v2 = vld [vmem:[#allocation2 + $0x68] sm:$0xff]  ;;  %v457_v11 = vld [vmem:[#allocation2 + $0x78] sm:$0xff] }
 0x223   : > { %v1661_v17 = vadd.f32 %v1504_v8, %v443_v6  ;;  %v1508_v18 = vadd.f32 %v1507_v16, %v1314_v14  ;;  %v456_v6 = vld [vmem:[#allocation2 + $0x70] sm:$0xff] }
 0x224   : > { %1724 = vst [vmem:[#allocation2] sm:$0xff] %v1660_v12  ;;  %v1662_v19 = vadd.f32 %v1506_v13, %v444_v10 }
 0x225   : > { %1725 = vst [vmem:[#allocation2 + $0x8] sm:$0xff] %v1661_v17  ;;  %v1663_v20 = vadd.f32 %v1508_v18, %v445_v15  ;;  %v458_v18 = vld [vmem:[#allocation2 + $0x80] sm:$0xff] }
 0x226   : > { %1726 = vst [vmem:[#allocation2 + $0x10] sm:$0xff] %v1662_v19  ;;  %v1318_v21 = vpop.f32.mrb[4].mxu1 }
 0x227   : > { %1727 = vst [vmem:[#allocation2 + $0x18] sm:$0xff] %v1663_v20  ;;  %v1511_v23 = vpop.f32.mrb[4].mxu0  ;;  %v1320_v25 = vpop.f32.mrb[5].mxu1 }
 0x228   : > { %v1512_v24 = vadd.f32 %v1511_v23, %v1318_v21  ;;  %v1513_v27 = vpop.f32.mrb[5].mxu0  ;;  %v1322_v29 = vpop.f32.mrb[6].mxu1 }
 0x229   : > { %v1514_v28 = vadd.f32 %v1513_v27, %v1320_v25  ;;  %v1515_v31 = vpop.f32.mrb[6].mxu0  ;;  %v1324_v34 = vpop.f32.mrb[7].mxu1 }
 0x22a   : > { %v1664_v32 = vadd.f32 %v1512_v24, %v446_v22  ;;  %v1516_v33 = vadd.f32 %v1515_v31, %v1322_v29  ;;  %v1517_v36 = vpop.f32.mrb[7].mxu0  ;;  %v459_v22 = vld [vmem:[#allocation2 + $0x88] sm:$0xff]  ;;  %v461_v31 = vld [vmem:[#allocation2 + $0x98] sm:$0xff] }
 0x22b   : > { %v1665_v37 = vadd.f32 %v1514_v28, %v447_v26  ;;  %v1518_v38 = vadd.f32 %v1517_v36, %v1324_v34  ;;  %v460_v26 = vld [vmem:[#allocation2 + $0x90] sm:$0xff] }
 0x22c   : > { %1728 = vst [vmem:[#allocation2 + $0x20] sm:$0xff] %v1664_v32  ;;  %v1666_v39 = vadd.f32 %v1516_v33, %v448_v30 }
 0x22d   : > { %1729 = vst [vmem:[#allocation2 + $0x28] sm:$0xff] %v1665_v37  ;;  %v1667_v40 = vadd.f32 %v1518_v38, %v449_v35  ;;  %v462_v38 = vld [vmem:[#allocation2 + $0xa0] sm:$0xff] }
 0x22e   : > { %1730 = vst [vmem:[#allocation2 + $0x30] sm:$0xff] %v1666_v39  ;;  %v1328_v41 = vpop.f32.mrb[8].mxu1 }
 0x22f   : > { %1731 = vst [vmem:[#allocation2 + $0x38] sm:$0xff] %v1667_v40  ;;  %v1521_v43 = vpop.f32.mrb[8].mxu0  ;;  %v1330_v45 = vpop.f32.mrb[9].mxu1 }
 0x230   : > { %v1522_v44 = vadd.f32 %v1521_v43, %v1328_v41  ;;  %v1523_v47 = vpop.f32.mrb[9].mxu0  ;;  %v1332_v49 = vpop.f32.mrb[10].mxu1 }
 0x231   : > { %v1524_v48 = vadd.f32 %v1523_v47, %v1330_v45  ;;  %v1525_v51 = vpop.f32.mrb[10].mxu0  ;;  %v1334_v54 = vpop.f32.mrb[11].mxu1 }
 0x232   : > { %v1668_v52 = vadd.f32 %v1522_v44, %v450_v42  ;;  %v1526_v53 = vadd.f32 %v1525_v51, %v1332_v49  ;;  %v1527_v56 = vpop.f32.mrb[11].mxu0  ;;  %v463_v42 = vld [vmem:[#allocation2 + $0xa8] sm:$0xff]  ;;  %v465_v51 = vld [vmem:[#allocation2 + $0xb8] sm:$0xff] }
 0x233   : > { %v1669_v57 = vadd.f32 %v1524_v48, %v451_v46  ;;  %v1528_v58 = vadd.f32 %v1527_v56, %v1334_v54  ;;  %v464_v46 = vld [vmem:[#allocation2 + $0xb0] sm:$0xff] }
 0x234   : > { %1732 = vst [vmem:[#allocation2 + $0x40] sm:$0xff] %v1668_v52  ;;  %v1670_v59 = vadd.f32 %v1526_v53, %v452_v50 }
 0x235   : > { %1733 = vst [vmem:[#allocation2 + $0x48] sm:$0xff] %v1669_v57  ;;  %v1671_v60 = vadd.f32 %v1528_v58, %v453_v55  ;;  %v466_v58 = vld [vmem:[#allocation2 + $0xc0] sm:$0xff] }
 0x236   : > { %1734 = vst [vmem:[#allocation2 + $0x50] sm:$0xff] %v1670_v59  ;;  %v1338_v61 = vpop.f32.mrb[12].mxu1 }
 0x237   : > { %1735 = vst [vmem:[#allocation2 + $0x58] sm:$0xff] %v1671_v60  ;;  %v1531_v63 = vpop.f32.mrb[12].mxu0  ;;  %v1340_v1 = vpop.f32.mrb[13].mxu1 }
 0x238   : > { %v1532_v0 = vadd.f32 %v1531_v63, %v1338_v61  ;;  %v1533_v3 = vpop.f32.mrb[13].mxu0  ;;  %v1342_v5 = vpop.f32.mrb[14].mxu1 }
 0x239   : > { %v1534_v4 = vadd.f32 %v1533_v3, %v1340_v1  ;;  %v1535_v7 = vpop.f32.mrb[14].mxu0  ;;  %v1344_v10 = vpop.f32.mrb[15].mxu1 }
 0x23a   : > { %v1672_v8 = vadd.f32 %v1532_v0, %v454_v62  ;;  %v1536_v9 = vadd.f32 %v1535_v7, %v1342_v5  ;;  %v1537_v12 = vpop.f32.mrb[15].mxu0  ;;  %v467_v62 = vld [vmem:[#allocation2 + $0xc8] sm:$0xff]  ;;  %v469_v7 = vld [vmem:[#allocation2 + $0xd8] sm:$0xff] }
 0x23b   : > { %v1673_v13 = vadd.f32 %v1534_v4, %v455_v2  ;;  %v1538_v14 = vadd.f32 %v1537_v12, %v1344_v10  ;;  %v468_v2 = vld [vmem:[#allocation2 + $0xd0] sm:$0xff] }
 0x23c   : > { %1736 = vst [vmem:[#allocation2 + $0x60] sm:$0xff] %v1672_v8  ;;  %v1674_v15 = vadd.f32 %v1536_v9, %v456_v6 }
 0x23d   : > { %1737 = vst [vmem:[#allocation2 + $0x68] sm:$0xff] %v1673_v13  ;;  %v1675_v16 = vadd.f32 %v1538_v14, %v457_v11  ;;  %v470_v14 = vld [vmem:[#allocation2 + $0xe0] sm:$0xff] }
 0x23e   : > { %1738 = vst [vmem:[#allocation2 + $0x70] sm:$0xff] %v1674_v15  ;;  %v1348_v17 = vpop.f32.mrb[16].mxu1 }
 0x23f   : > { %1739 = vst [vmem:[#allocation2 + $0x78] sm:$0xff] %v1675_v16  ;;  %v1541_v19 = vpop.f32.mrb[16].mxu0  ;;  %v1350_v21 = vpop.f32.mrb[17].mxu1 }
 0x240   : > { %v1542_v20 = vadd.f32 %v1541_v19, %v1348_v17  ;;  %v1543_v23 = vpop.f32.mrb[17].mxu0  ;;  %v1352_v25 = vpop.f32.mrb[18].mxu1 }
 0x241   : > { %v1544_v24 = vadd.f32 %v1543_v23, %v1350_v21  ;;  %v1545_v27 = vpop.f32.mrb[18].mxu0  ;;  %v1354_v30 = vpop.f32.mrb[19].mxu1 }
 0x242   : > { %v1676_v28 = vadd.f32 %v1542_v20, %v458_v18  ;;  %v1546_v29 = vadd.f32 %v1545_v27, %v1352_v25  ;;  %v1547_v32 = vpop.f32.mrb[19].mxu0  ;;  %v471_v18 = vld [vmem:[#allocation2 + $0xe8] sm:$0xff]  ;;  %v473_v27 = vld [vmem:[#allocation2 + $0xf8] sm:$0xff] }
 0x243   : > { %v1677_v33 = vadd.f32 %v1544_v24, %v459_v22  ;;  %v1548_v34 = vadd.f32 %v1547_v32, %v1354_v30  ;;  %v472_v22 = vld [vmem:[#allocation2 + $0xf0] sm:$0xff] }
 0x244   : > { %1740 = vst [vmem:[#allocation2 + $0x80] sm:$0xff] %v1676_v28  ;;  %v1678_v35 = vadd.f32 %v1546_v29, %v460_v26 }
 0x245   : > { %1741 = vst [vmem:[#allocation2 + $0x88] sm:$0xff] %v1677_v33  ;;  %v1679_v36 = vadd.f32 %v1548_v34, %v461_v31  ;;  %v474_v34 = vld [vmem:[#allocation2 + $0x100] sm:$0xff] }
 0x246   : > { %1742 = vst [vmem:[#allocation2 + $0x90] sm:$0xff] %v1678_v35  ;;  %v1358_v37 = vpop.f32.mrb[20].mxu1 }
 0x247   : > { %1743 = vst [vmem:[#allocation2 + $0x98] sm:$0xff] %v1679_v36  ;;  %v1551_v39 = vpop.f32.mrb[20].mxu0  ;;  %v1360_v41 = vpop.f32.mrb[21].mxu1 }
 0x248   : > { %v1552_v40 = vadd.f32 %v1551_v39, %v1358_v37  ;;  %v1553_v43 = vpop.f32.mrb[21].mxu0  ;;  %v1362_v45 = vpop.f32.mrb[22].mxu1 }
 0x249   : > { %v1554_v44 = vadd.f32 %v1553_v43, %v1360_v41  ;;  %v1555_v47 = vpop.f32.mrb[22].mxu0  ;;  %v1364_v50 = vpop.f32.mrb[23].mxu1 }
 0x24a   : > { %v1680_v48 = vadd.f32 %v1552_v40, %v462_v38  ;;  %v1556_v49 = vadd.f32 %v1555_v47, %v1362_v45  ;;  %v1557_v52 = vpop.f32.mrb[23].mxu0  ;;  %v475_v38 = vld [vmem:[#allocation2 + $0x108] sm:$0xff]  ;;  %v477_v47 = vld [vmem:[#allocation2 + $0x118] sm:$0xff] }
 0x24b   : > { %v1681_v53 = vadd.f32 %v1554_v44, %v463_v42  ;;  %v1558_v54 = vadd.f32 %v1557_v52, %v1364_v50  ;;  %v476_v42 = vld [vmem:[#allocation2 + $0x110] sm:$0xff] }
 0x24c   : > { %1744 = vst [vmem:[#allocation2 + $0xa0] sm:$0xff] %v1680_v48  ;;  %v1682_v55 = vadd.f32 %v1556_v49, %v464_v46 }
 0x24d   : > { %1745 = vst [vmem:[#allocation2 + $0xa8] sm:$0xff] %v1681_v53  ;;  %v1683_v56 = vadd.f32 %v1558_v54, %v465_v51  ;;  %v478_v54 = vld [vmem:[#allocation2 + $0x120] sm:$0xff] }
 0x24e   : > { %1746 = vst [vmem:[#allocation2 + $0xb0] sm:$0xff] %v1682_v55  ;;  %v1368_v57 = vpop.f32.mrb[24].mxu1 }
 0x24f   : > { %1747 = vst [vmem:[#allocation2 + $0xb8] sm:$0xff] %v1683_v56  ;;  %v1561_v59 = vpop.f32.mrb[24].mxu0  ;;  %v1370_v61 = vpop.f32.mrb[25].mxu1 }
 0x250   : > { %v1562_v60 = vadd.f32 %v1561_v59, %v1368_v57  ;;  %v1563_v63 = vpop.f32.mrb[25].mxu0  ;;  %v1372_v1 = vpop.f32.mrb[26].mxu1 }
 0x251   : > { %v1564_v0 = vadd.f32 %v1563_v63, %v1370_v61  ;;  %v1565_v3 = vpop.f32.mrb[26].mxu0  ;;  %v1374_v6 = vpop.f32.mrb[27].mxu1 }
 0x252   : > { %v1684_v4 = vadd.f32 %v1562_v60, %v466_v58  ;;  %v1566_v5 = vadd.f32 %v1565_v3, %v1372_v1  ;;  %v1567_v8 = vpop.f32.mrb[27].mxu0  ;;  %v479_v58 = vld [vmem:[#allocation2 + $0x128] sm:$0xff]  ;;  %v481_v3 = vld [vmem:[#allocation2 + $0x138] sm:$0xff] }
 0x253   : > { %v1685_v9 = vadd.f32 %v1564_v0, %v467_v62  ;;  %v1568_v10 = vadd.f32 %v1567_v8, %v1374_v6  ;;  %v480_v62 = vld [vmem:[#allocation2 + $0x130] sm:$0xff] }
 0x254   : > { %1748 = vst [vmem:[#allocation2 + $0xc0] sm:$0xff] %v1684_v4  ;;  %v1686_v11 = vadd.f32 %v1566_v5, %v468_v2 }
 0x255   : > { %1749 = vst [vmem:[#allocation2 + $0xc8] sm:$0xff] %v1685_v9  ;;  %v1687_v12 = vadd.f32 %v1568_v10, %v469_v7  ;;  %v482_v10 = vld [vmem:[#allocation2 + $0x140] sm:$0xff] }
 0x256   : > { %1750 = vst [vmem:[#allocation2 + $0xd0] sm:$0xff] %v1686_v11  ;;  %v1378_v13 = vpop.f32.mrb[28].mxu1 }
 0x257   : > { %1751 = vst [vmem:[#allocation2 + $0xd8] sm:$0xff] %v1687_v12  ;;  %v1571_v15 = vpop.f32.mrb[28].mxu0  ;;  %v1380_v17 = vpop.f32.mrb[29].mxu1 }
 0x258   : > { %v1572_v16 = vadd.f32 %v1571_v15, %v1378_v13  ;;  %v1573_v19 = vpop.f32.mrb[29].mxu0  ;;  %v1382_v21 = vpop.f32.mrb[30].mxu1 }
 0x259   : > { %v1574_v20 = vadd.f32 %v1573_v19, %v1380_v17  ;;  %v1575_v23 = vpop.f32.mrb[30].mxu0  ;;  %v1384_v26 = vpop.f32.mrb[31].mxu1 }
 0x25a   : > { %v1688_v24 = vadd.f32 %v1572_v16, %v470_v14  ;;  %v1576_v25 = vadd.f32 %v1575_v23, %v1382_v21  ;;  %v1577_v28 = vpop.f32.mrb[31].mxu0  ;;  %v483_v14 = vld [vmem:[#allocation2 + $0x148] sm:$0xff]  ;;  %v485_v23 = vld [vmem:[#allocation2 + $0x158] sm:$0xff] }
 0x25b   : > { %v1689_v29 = vadd.f32 %v1574_v20, %v471_v18  ;;  %v1578_v30 = vadd.f32 %v1577_v28, %v1384_v26  ;;  %v484_v18 = vld [vmem:[#allocation2 + $0x150] sm:$0xff] }
 0x25c   : > { %1752 = vst [vmem:[#allocation2 + $0xe0] sm:$0xff] %v1688_v24  ;;  %v1690_v31 = vadd.f32 %v1576_v25, %v472_v22 }
 0x25d   : > { %1753 = vst [vmem:[#allocation2 + $0xe8] sm:$0xff] %v1689_v29  ;;  %v1691_v32 = vadd.f32 %v1578_v30, %v473_v27  ;;  %v486_v30 = vld [vmem:[#allocation2 + $0x160] sm:$0xff] }
 0x25e   : > { %1754 = vst [vmem:[#allocation2 + $0xf0] sm:$0xff] %v1690_v31  ;;  %v1388_v33 = vpop.f32.mrb[32].mxu1 }
 0x25f   : > { %1755 = vst [vmem:[#allocation2 + $0xf8] sm:$0xff] %v1691_v32  ;;  %v1581_v35 = vpop.f32.mrb[32].mxu0  ;;  %v1390_v37 = vpop.f32.mrb[33].mxu1 }
 0x260   : > { %v1582_v36 = vadd.f32 %v1581_v35, %v1388_v33  ;;  %v1583_v39 = vpop.f32.mrb[33].mxu0  ;;  %v1392_v41 = vpop.f32.mrb[34].mxu1 }
 0x261   : > { %v1584_v40 = vadd.f32 %v1583_v39, %v1390_v37  ;;  %v1585_v43 = vpop.f32.mrb[34].mxu0  ;;  %v1394_v46 = vpop.f32.mrb[35].mxu1 }
 0x262   : > { %v1692_v44 = vadd.f32 %v1582_v36, %v474_v34  ;;  %v1586_v45 = vadd.f32 %v1585_v43, %v1392_v41  ;;  %v1587_v48 = vpop.f32.mrb[35].mxu0  ;;  %v487_v34 = vld [vmem:[#allocation2 + $0x168] sm:$0xff]  ;;  %v489_v43 = vld [vmem:[#allocation2 + $0x178] sm:$0xff] }
 0x263   : > { %v1693_v49 = vadd.f32 %v1584_v40, %v475_v38  ;;  %v1588_v50 = vadd.f32 %v1587_v48, %v1394_v46  ;;  %v488_v38 = vld [vmem:[#allocation2 + $0x170] sm:$0xff] }
 0x264   : > { %1756 = vst [vmem:[#allocation2 + $0x100] sm:$0xff] %v1692_v44  ;;  %v1694_v51 = vadd.f32 %v1586_v45, %v476_v42 }
 0x265   : > { %1757 = vst [vmem:[#allocation2 + $0x108] sm:$0xff] %v1693_v49  ;;  %v1695_v52 = vadd.f32 %v1588_v50, %v477_v47  ;;  %v490_v50 = vld [vmem:[#allocation2 + $0x180] sm:$0xff] }
 0x266   : > { %1758 = vst [vmem:[#allocation2 + $0x110] sm:$0xff] %v1694_v51  ;;  %v1398_v53 = vpop.f32.mrb[36].mxu1 }
 0x267   : > { %1759 = vst [vmem:[#allocation2 + $0x118] sm:$0xff] %v1695_v52  ;;  %v1591_v55 = vpop.f32.mrb[36].mxu0  ;;  %v1400_v57 = vpop.f32.mrb[37].mxu1 }
 0x268   : > { %v1592_v56 = vadd.f32 %v1591_v55, %v1398_v53  ;;  %v1593_v59 = vpop.f32.mrb[37].mxu0  ;;  %v1402_v61 = vpop.f32.mrb[38].mxu1 }
 0x269   : > { %v1594_v60 = vadd.f32 %v1593_v59, %v1400_v57  ;;  %v1595_v63 = vpop.f32.mrb[38].mxu0  ;;  %v1404_v2 = vpop.f32.mrb[39].mxu1 }
 0x26a   : > { %v1696_v0 = vadd.f32 %v1592_v56, %v478_v54  ;;  %v1596_v1 = vadd.f32 %v1595_v63, %v1402_v61  ;;  %v1597_v4 = vpop.f32.mrb[39].mxu0  ;;  %v491_v54 = vld [vmem:[#allocation2 + $0x188] sm:$0xff]  ;;  %v493_v63 = vld [vmem:[#allocation2 + $0x198] sm:$0xff] }
 0x26b   : > { %v1697_v5 = vadd.f32 %v1594_v60, %v479_v58  ;;  %v1598_v6 = vadd.f32 %v1597_v4, %v1404_v2  ;;  %v492_v58 = vld [vmem:[#allocation2 + $0x190] sm:$0xff] }
 0x26c   : > { %1760 = vst [vmem:[#allocation2 + $0x120] sm:$0xff] %v1696_v0  ;;  %v1698_v7 = vadd.f32 %v1596_v1, %v480_v62 }
 0x26d   : > { %1761 = vst [vmem:[#allocation2 + $0x128] sm:$0xff] %v1697_v5  ;;  %v1699_v8 = vadd.f32 %v1598_v6, %v481_v3  ;;  %v494_v6 = vld [vmem:[#allocation2 + $0x1a0] sm:$0xff] }
 0x26e   : > { %1762 = vst [vmem:[#allocation2 + $0x130] sm:$0xff] %v1698_v7  ;;  %v1408_v9 = vpop.f32.mrb[40].mxu1 }
 0x26f   : > { %1763 = vst [vmem:[#allocation2 + $0x138] sm:$0xff] %v1699_v8  ;;  %v1601_v11 = vpop.f32.mrb[40].mxu0  ;;  %v1410_v13 = vpop.f32.mrb[41].mxu1 }
 0x270   : > { %v1602_v12 = vadd.f32 %v1601_v11, %v1408_v9  ;;  %v1603_v15 = vpop.f32.mrb[41].mxu0  ;;  %v1412_v17 = vpop.f32.mrb[42].mxu1 }
 0x271   : > { %v1604_v16 = vadd.f32 %v1603_v15, %v1410_v13  ;;  %v1605_v19 = vpop.f32.mrb[42].mxu0  ;;  %v1414_v22 = vpop.f32.mrb[43].mxu1 }
 0x272   : > { %v1700_v20 = vadd.f32 %v1602_v12, %v482_v10  ;;  %v1606_v21 = vadd.f32 %v1605_v19, %v1412_v17  ;;  %v1607_v24 = vpop.f32.mrb[43].mxu0  ;;  %v495_v10 = vld [vmem:[#allocation2 + $0x1a8] sm:$0xff]  ;;  %v497_v19 = vld [vmem:[#allocation2 + $0x1b8] sm:$0xff] }
 0x273   : > { %v1701_v25 = vadd.f32 %v1604_v16, %v483_v14  ;;  %v1608_v26 = vadd.f32 %v1607_v24, %v1414_v22  ;;  %v496_v14 = vld [vmem:[#allocation2 + $0x1b0] sm:$0xff] }
 0x274   : > { %1764 = vst [vmem:[#allocation2 + $0x140] sm:$0xff] %v1700_v20  ;;  %v1702_v27 = vadd.f32 %v1606_v21, %v484_v18 }
 0x275   : > { %1765 = vst [vmem:[#allocation2 + $0x148] sm:$0xff] %v1701_v25  ;;  %v1703_v28 = vadd.f32 %v1608_v26, %v485_v23  ;;  %v498_v26 = vld [vmem:[#allocation2 + $0x1c0] sm:$0xff] }
 0x276   : > { %1766 = vst [vmem:[#allocation2 + $0x150] sm:$0xff] %v1702_v27  ;;  %v1418_v29 = vpop.f32.mrb[44].mxu1 }
 0x277   : > { %1767 = vst [vmem:[#allocation2 + $0x158] sm:$0xff] %v1703_v28  ;;  %v1611_v31 = vpop.f32.mrb[44].mxu0  ;;  %v1420_v33 = vpop.f32.mrb[45].mxu1 }
 0x278   : > { %v1612_v32 = vadd.f32 %v1611_v31, %v1418_v29  ;;  %v1613_v35 = vpop.f32.mrb[45].mxu0  ;;  %v1422_v37 = vpop.f32.mrb[46].mxu1 }
 0x279   : > { %v1614_v36 = vadd.f32 %v1613_v35, %v1420_v33  ;;  %v1615_v39 = vpop.f32.mrb[46].mxu0  ;;  %v1424_v42 = vpop.f32.mrb[47].mxu1 }
 0x27a   : > { %v1704_v40 = vadd.f32 %v1612_v32, %v486_v30  ;;  %v1616_v41 = vadd.f32 %v1615_v39, %v1422_v37  ;;  %v1617_v44 = vpop.f32.mrb[47].mxu0  ;;  %v499_v30 = vld [vmem:[#allocation2 + $0x1c8] sm:$0xff]  ;;  %v501_v39 = vld [vmem:[#allocation2 + $0x1d8] sm:$0xff] }
 0x27b   : > { %v1705_v45 = vadd.f32 %v1614_v36, %v487_v34  ;;  %v1618_v46 = vadd.f32 %v1617_v44, %v1424_v42  ;;  %v500_v34 = vld [vmem:[#allocation2 + $0x1d0] sm:$0xff] }
 0x27c   : > { %1768 = vst [vmem:[#allocation2 + $0x160] sm:$0xff] %v1704_v40  ;;  %v1706_v47 = vadd.f32 %v1616_v41, %v488_v38 }
 0x27d   : > { %1769 = vst [vmem:[#allocation2 + $0x168] sm:$0xff] %v1705_v45  ;;  %v1707_v48 = vadd.f32 %v1618_v46, %v489_v43  ;;  %v502_v46 = vld [vmem:[#allocation2 + $0x1e0] sm:$0xff] }
 0x27e   : > { %1770 = vst [vmem:[#allocation2 + $0x170] sm:$0xff] %v1706_v47  ;;  %v1428_v49 = vpop.f32.mrb[48].mxu1 }
 0x27f   : > { %1771 = vst [vmem:[#allocation2 + $0x178] sm:$0xff] %v1707_v48  ;;  %v1621_v51 = vpop.f32.mrb[48].mxu0  ;;  %v1430_v53 = vpop.f32.mrb[49].mxu1 }
 0x280   : > { %v1622_v52 = vadd.f32 %v1621_v51, %v1428_v49  ;;  %v1623_v55 = vpop.f32.mrb[49].mxu0  ;;  %v1432_v57 = vpop.f32.mrb[50].mxu1 }
 0x281   : > { %v1624_v56 = vadd.f32 %v1623_v55, %v1430_v53  ;;  %v1625_v59 = vpop.f32.mrb[50].mxu0  ;;  %v1434_v62 = vpop.f32.mrb[51].mxu1 }
 0x282   : > { %v1708_v60 = vadd.f32 %v1622_v52, %v490_v50  ;;  %v1626_v61 = vadd.f32 %v1625_v59, %v1432_v57  ;;  %v1627_v0 = vpop.f32.mrb[51].mxu0  ;;  %v503_v50 = vld [vmem:[#allocation2 + $0x1e8] sm:$0xff]  ;;  %v505_v59 = vld [vmem:[#allocation2 + $0x1f8] sm:$0xff] }
 0x283   : > { %v1709_v1 = vadd.f32 %v1624_v56, %v491_v54  ;;  %v1628_v2 = vadd.f32 %v1627_v0, %v1434_v62  ;;  %v504_v54 = vld [vmem:[#allocation2 + $0x1f0] sm:$0xff] }
 0x284   : > { %1772 = vst [vmem:[#allocation2 + $0x180] sm:$0xff] %v1708_v60  ;;  %v1710_v3 = vadd.f32 %v1626_v61, %v492_v58 }
 0x285   : > { %1773 = vst [vmem:[#allocation2 + $0x188] sm:$0xff] %v1709_v1  ;;  %v1711_v4 = vadd.f32 %v1628_v2, %v493_v63  ;;  %v1792_v1 = vld [vmem:[#allocation2] sm:$0xff] (!%p2874_p6)  ;;  %v1793_v2 = vld [vmem:[#allocation2 + $0x8] sm:$0xff] (!%p2874_p6) }
 0x286   : > { %1774 = vst [vmem:[#allocation2 + $0x190] sm:$0xff] %v1710_v3  ;;  %v1438_v5 = vpop.f32.mrb[52].mxu1  ;;  %v1856_v3 = vld [vmem:[%s4184_s5] sm:$0xff] (!%p2874_p6) }
 0x287   : > { %1775 = vst [vmem:[#allocation2 + $0x198] sm:$0xff] %v1711_v4  ;;  %v1631_v7 = vpop.f32.mrb[52].mxu0  ;;  %v1440_v9 = vpop.f32.mrb[53].mxu1  ;;  %v1857_v4 = vld [vmem:[%s4184_s5 + $0x8] sm:$0xff] (!%p2874_p6) }
 0x288   : > { %v1632_v8 = vadd.f32 %v1631_v7, %v1438_v5  ;;  %v1633_v11 = vpop.f32.mrb[53].mxu0  ;;  %v1442_v13 = vpop.f32.mrb[54].mxu1  ;;  %v1920_v5 = vld [vmem:[%s4190_s16] sm:$0xff] (!%p2874_p6)  ;;  %v1991_v7 = vmul.f32 (!%p2874_p6), -1.0, %v1793_v2 }
 0x289   : > { %v1634_v12 = vadd.f32 %v1633_v11, %v1440_v9  ;;  %v1635_v15 = vpop.f32.mrb[54].mxu0  ;;  %v1444_v18 = vpop.f32.mrb[55].mxu1  ;;  %v2056_v9 = vmul.f32 (!%p2874_p6), %v1857_v4, %v1793_v2  ;;  %v1794_v11 = vld [vmem:[#allocation2 + $0x10] sm:$0xff] (!%p2874_p6)  ;;  %v1803_v2 = vld [vmem:[#allocation2 + $0x58] sm:$0xff] (!%p2874_p6) }
 0x28a   : > { %v1712_v16 = vadd.f32 %v1632_v8, %v494_v6  ;;  %v1636_v17 = vadd.f32 %v1635_v15, %v1442_v13  ;;  %v1637_v20 = vpop.f32.mrb[55].mxu0  ;;  %v1921_v6 = vld [vmem:[%s4190_s16 + $0x8] sm:$0xff] (!%p2874_p6)  ;;  %v2055_v8 = vmul.f32 (!%p2874_p6), %v1856_v3, %v1792_v1  ;;  %v1858_v13 = vld [vmem:[%s4184_s5 + $0x10] sm:$0xff] (!%p2874_p6)  ;;  %v1859_v15 = vld [vmem:[%s4184_s5 + $0x18] sm:$0xff] (!%p2874_p6) }
 0x28b   : > { %v1713_v21 = vadd.f32 %v1634_v12, %v495_v10  ;;  %v1638_v22 = vadd.f32 %v1637_v20, %v1444_v18  ;;  %v2120_v10 = vmul.f32 (!%p2874_p6), %v1921_v6, %v1792_v1  ;;  %v1795_v12 = vld [vmem:[#allocation2 + $0x18] sm:$0xff] (!%p2874_p6)  ;;  %v1802_v1 = vld [vmem:[#allocation2 + $0x50] sm:$0xff] (!%p2874_p6) }
 0x28c   : > { %1776 = vst [vmem:[#allocation2 + $0x1a0] sm:$0xff] %v1712_v16  ;;  %v1714_v23 = vadd.f32 %v1636_v17, %v496_v14  ;;  %v2119_v14 = vmul.f32 (!%p2874_p6), %v1991_v7, %v1920_v5  ;;  %v1922_v16 = vld [vmem:[%s4190_s16 + $0x10] sm:$0xff] (!%p2874_p6)  ;;  %v1923_v17 = vld [vmem:[%s4190_s16 + $0x18] sm:$0xff] (!%p2874_p6)  ;;  %v1993_v18 = vmul.f32 (!%p2874_p6), -1.0, %v1795_v12 }
 0x28d   : > { %1777 = vst [vmem:[#allocation2 + $0x1a8] sm:$0xff] %v1713_v21  ;;  %v1715_v24 = vadd.f32 %v1638_v22, %v497_v19  ;;  %v2057_v19 = vmul.f32 (!%p2874_p6), %v1858_v13, %v1794_v11  ;;  %v2184_v20 = vadd.f32 (!%p2874_p6), %v2120_v10, %v2056_v9  ;;  %v2058_v21 = vmul.f32 (!%p2874_p6), %v1859_v15, %v1795_v12  ;;  %v1866_v3 = vld [vmem:[%s4184_s5 + $0x50] sm:$0xff] (!%p2874_p6)  ;;  %v1931_v10 = vld [vmem:[%s4190_s16 + $0x58] sm:$0xff] (!%p2874_p6)  ;;  %v1804_v15 = vld [vmem:[#allocation2 + $0x60] sm:$0xff] (!%p2874_p6) }
 0x28e   : > { %1778 = vst [vmem:[#allocation2 + $0x1b0] sm:$0xff] %v1714_v23  ;;  %v1448_v25 = vpop.f32.mrb[56].mxu1  ;;  %v2122_v22 = vmul.f32 (!%p2874_p6), %v1923_v17, %v1794_v11  ;;  %v1796_v23 = vld [vmem:[#allocation2 + $0x20] sm:$0xff] (!%p2874_p6)  ;;  %v1930_v9 = vld [vmem:[%s4190_s16 + $0x50] sm:$0xff] (!%p2874_p6) }
 0x28f   : > { %1779 = vst [vmem:[#allocation2 + $0x1b8] sm:$0xff] %v1715_v24  ;;  %v1641_v27 = vpop.f32.mrb[56].mxu0  ;;  %v1450_v29 = vpop.f32.mrb[57].mxu1  ;;  %v1797_v24 = vld [vmem:[#allocation2 + $0x28] sm:$0xff] (!%p2874_p6)  ;;  %v1868_v17 = vld [vmem:[%s4184_s5 + $0x60] sm:$0xff] (!%p2874_p6) }
 0x290   : > { %v1642_v28 = vadd.f32 %v1641_v27, %v1448_v25  ;;  %v1643_v31 = vpop.f32.mrb[57].mxu0  ;;  %v1452_v33 = vpop.f32.mrb[58].mxu1  ;;  %v1860_v25 = vld [vmem:[%s4184_s5 + $0x20] sm:$0xff] (!%p2874_p6)  ;;  %v2121_v27 = vmul.f32 (!%p2874_p6), %v1993_v18, %v1922_v16  ;;  %v1805_v16 = vld [vmem:[#allocation2 + $0x68] sm:$0xff] (!%p2874_p6) }
 0x291   : > { %v1644_v32 = vadd.f32 %v1643_v31, %v1450_v29  ;;  %v1645_v35 = vpop.f32.mrb[58].mxu0  ;;  %v1454_v38 = vpop.f32.mrb[59].mxu1  ;;  %v1924_v29 = vld [vmem:[%s4190_s16 + $0x20] sm:$0xff] (!%p2874_p6)  ;;  %v1995_v31 = vmul.f32 (!%p2874_p6), -1.0, %v1797_v24 }
 0x292   : > { %v1716_v36 = vadd.f32 %v1642_v28, %v498_v26  ;;  %v1646_v37 = vadd.f32 %v1645_v35, %v1452_v33  ;;  %v1647_v40 = vpop.f32.mrb[59].mxu0  ;;  %v2183_v26 = vadd.f32 (!%p2874_p6), %v2119_v14, %v2055_v8  ;;  %v1861_v28 = vld [vmem:[%s4184_s5 + $0x28] sm:$0xff] (!%p2874_p6)  ;;  %v2248_v33 = vmul.f32 (!%p2874_p6), 0.0625, %v2184_v20  ;;  %v1867_v8 = vld [vmem:[%s4184_s5 + $0x58] sm:$0xff] (!%p2874_p6) }
 0x293   : > { %v1717_v41 = vadd.f32 %v1644_v32, %v499_v30  ;;  %v1648_v42 = vadd.f32 %v1647_v40, %v1454_v38  ;;  %v1925_v30 = vld [vmem:[%s4190_s16 + $0x28] sm:$0xff] (!%p2874_p6)  ;;  %v2059_v32 = vmul.f32 (!%p2874_p6), %v1860_v25, %v1796_v23  ;;  %v2060_v35 = vmul.f32 (!%p2874_p6), %v1861_v28, %v1797_v24  ;;  %v1799_v38 = vld [vmem:[#allocation2 + $0x38] sm:$0xff] (!%p2874_p6) }
 0x294   : > { %1780 = vst [vmem:[#allocation2 + $0x1c0] sm:$0xff] %v1716_v36  ;;  %v1718_v43 = vadd.f32 %v1646_v37, %v500_v34  ;;  %v2186_v34 = vadd.f32 (!%p2874_p6), %v2122_v22, %v2058_v21  ;;  %v2124_v36 = vmul.f32 (!%p2874_p6), %v1925_v30, %v1796_v23  ;;  %v1798_v37 = vld [vmem:[#allocation2 + $0x30] sm:$0xff] (!%p2874_p6)  ;;  %v2247_v40 = vmul.f32 (!%p2874_p6), 0.0625, %v2183_v26  ;;  %v1869_v22 = vld [vmem:[%s4184_s5 + $0x68] sm:$0xff] (!%p2874_p6) }
 0x295   : > { %1781 = vst [vmem:[#allocation2 + $0x1c8] sm:$0xff] %v1717_v41  ;;  %v1719_v44 = vadd.f32 %v1648_v42, %v501_v39  ;;  %v1862_v39 = vld [vmem:[%s4184_s5 + $0x30] sm:$0xff] (!%p2874_p6)  ;;  %v2185_v41 = vadd.f32 (!%p2874_p6), %v2121_v27, %v2057_v19  ;;  %v2123_v42 = vmul.f32 (!%p2874_p6), %v1995_v31, %v1924_v29  ;;  %v2001_v14 = vmul.f32 (!%p2874_p6), -1.0, %v1803_v2  ;;  %v1932_v27 = vld [vmem:[%s4190_s16 + $0x60] sm:$0xff] (!%p2874_p6)  ;;  %v1933_v28 = vld [vmem:[%s4190_s16 + $0x68] sm:$0xff] (!%p2874_p6) }
 0x296   : > { %1782 = vst [vmem:[#allocation2 + $0x1d0] sm:$0xff] %v1718_v43  ;;  %v1458_v45 = vpop.f32.mrb[60].mxu1  ;;  %v1863_v43 = vld [vmem:[%s4184_s5 + $0x38] sm:$0xff] (!%p2874_p6)  ;;  %v2065_v20 = vmul.f32 (!%p2874_p6), %v1866_v3, %v1802_v1  ;;  %v2066_v21 = vmul.f32 (!%p2874_p6), %v1867_v8, %v1803_v2  ;;  %v2130_v30 = vmul.f32 (!%p2874_p6), %v1931_v10, %v1802_v1  ;;  %v2003_v31 = vmul.f32 (!%p2874_p6), -1.0, %v1805_v16  ;;  %v1810_v2 = vld [vmem:[#allocation2 + $0x90] sm:$0xff] (!%p2874_p6) }
 0x297   : > { %1783 = vst [vmem:[#allocation2 + $0x1d8] sm:$0xff] %v1719_v44  ;;  %v1651_v47 = vpop.f32.mrb[60].mxu0  ;;  %v1460_v49 = vpop.f32.mrb[61].mxu1  ;;  %v1926_v44 = vld [vmem:[%s4190_s16 + $0x30] sm:$0xff] (!%p2874_p6)  ;;  %v2129_v26 = vmul.f32 (!%p2874_p6), %v2001_v14, %v1930_v9  ;;  %v1807_v29 = vld [vmem:[#allocation2 + $0x78] sm:$0xff] (!%p2874_p6) }
 0x298   : > { %v1652_v48 = vadd.f32 %v1651_v47, %v1458_v45  ;;  %v1653_v51 = vpop.f32.mrb[61].mxu0  ;;  %v1462_v53 = vpop.f32.mrb[62].mxu1  ;;  %v1927_v45 = vld [vmem:[%s4190_s16 + $0x38] sm:$0xff] (!%p2874_p6)  ;;  %v2250_v47 = vmul.f32 (!%p2874_p6), 0.0625, %v2186_v34  ;;  %v1806_v34 = vld [vmem:[#allocation2 + $0x70] sm:$0xff] (!%p2874_p6) }
 0x299   : > { %v1654_v52 = vadd.f32 %v1653_v51, %v1460_v49  ;;  %v1655_v55 = vpop.f32.mrb[62].mxu0  ;;  %v1464_v58 = vpop.f32.mrb[63].mxu1  ;;  %1791 = sbr.rel (%p2874_p6) target bundleno = 746 (0x2ea), region = 60  ;;  %v2061_v49 = vmul.f32 (!%p2874_p6), %v1862_v39, %v1798_v37  ;;  %v1800_v51 = vld [vmem:[#allocation2 + $0x40] sm:$0xff] (!%p2874_p6)  ;;  %v1874_v3 = vld [vmem:[%s4184_s5 + $0x90] sm:$0xff] (!%p2874_p6)  ;;  %v1939_v10 = vld [vmem:[%s4190_s16 + $0x98] sm:$0xff] (!%p2874_p6) }
 0x29a   : > { %v1720_v56 = vadd.f32 %v1652_v48, %v502_v46  ;;  %v1656_v57 = vadd.f32 %v1655_v55, %v1462_v53  ;;  %v1657_v60 = vpop.f32.mrb[63].mxu0  ;;  %v1997_v46 = vmul.f32 (!%p2874_p6), -1.0, %v1799_v38  ;;  %v2188_v48 = vadd.f32 (!%p2874_p6), %v2124_v36, %v2060_v35  ;;  %v1864_v53 = vld [vmem:[%s4184_s5 + $0x40] sm:$0xff] (!%p2874_p6)  ;;  %v1870_v35 = vld [vmem:[%s4184_s5 + $0x70] sm:$0xff] (!%p2874_p6)  ;;  %v1871_v36 = vld [vmem:[%s4184_s5 + $0x78] sm:$0xff] (!%p2874_p6) }
 0x29b   : > { %v1721_v61 = vadd.f32 %v1654_v52, %v503_v50  ;;  %v1658_v62 = vadd.f32 %v1657_v60, %v1464_v58  ;;  %v2062_v50 = vmul.f32 (!%p2874_p6), %v1863_v43, %v1799_v38  ;;  %v1801_v52 = vld [vmem:[#allocation2 + $0x48] sm:$0xff] (!%p2874_p6)  ;;  %v2249_v55 = vmul.f32 (!%p2874_p6), 0.0625, %v2185_v41  ;;  %v1934_v41 = vld [vmem:[%s4190_s16 + $0x70] sm:$0xff] (!%p2874_p6)  ;;  %v1808_v43 = vld [vmem:[#allocation2 + $0x80] sm:$0xff] (!%p2874_p6) }
 0x29c   : > { %1784 = vst [vmem:[#allocation2 + $0x1e0] sm:$0xff] %v1720_v56  ;;  %v1722_v63 = vadd.f32 %v1656_v57, %v504_v54  ;;  %v2920_v54 = vpack.c.bf16 (!%p2874_p6), %v2248_v33, %v2247_v40  ;;  %v2187_v56 = vadd.f32 (!%p2874_p6), %v2123_v42, %v2059_v32  ;;  %v2125_v57 = vmul.f32 (!%p2874_p6), %v1997_v46, %v1926_v44  ;;  %v1865_v58 = vld [vmem:[%s4184_s5 + $0x48] sm:$0xff] (!%p2874_p6)  ;;  %v1935_v42 = vld [vmem:[%s4190_s16 + $0x78] sm:$0xff] (!%p2874_p6)  ;;  %v1938_v9 = vld [vmem:[%s4190_s16 + $0x90] sm:$0xff] (!%p2874_p6) }
 0x29d   : > { %1785 = vst [vmem:[#allocation2 + $0x1e8] sm:$0xff] %v1721_v61  ;;  %v1723_v0 = vadd.f32 %v1658_v62, %v505_v59  ;;  %v1928_v59 = vld [vmem:[%s4190_s16 + $0x40] sm:$0xff] (!%p2874_p6)  ;;  %v1929_v60 = vld [vmem:[%s4190_s16 + $0x48] sm:$0xff] (!%p2874_p6)  ;;  %v2252_v61 = vmul.f32 (!%p2874_p6), 0.0625, %v2188_v48  ;;  %v2126_v62 = vmul.f32 (!%p2874_p6), %v1927_v45, %v1798_v37  ;;  %v2921_v4 = vpack.c.bf16 (!%p2874_p6), %v2250_v47, %v2249_v55 }
 0x29e   : > { %1786 = vst [vmem:[#allocation2 + $0x1f0] sm:$0xff] %v1722_v63  ;;  %v1999_v63 = vmul.f32 (!%p2874_p6), -1.0, %v1801_v52  ;;  %2503 = vst [vmem:[%s4199_s1] sm:$0xff] (!%p2874_p6), %v2920_v54  ;;  %v2251_v5 = vmul.f32 (!%p2874_p6), 0.0625, %v2187_v56  ;;  %v2189_v6 = vadd.f32 (!%p2874_p6), %v2125_v57, %v2061_v49  ;;  %v2064_v7 = vmul.f32 (!%p2874_p6), %v1865_v58, %v1801_v52  ;;  %v1809_v48 = vld [vmem:[#allocation2 + $0x88] sm:$0xff] (!%p2874_p6)  ;;  %v1872_v49 = vld [vmem:[%s4184_s5 + $0x80] sm:$0xff] (!%p2874_p6) }
 0x29f   : > { %1787 = vst [vmem:[#allocation2 + $0x1f8] sm:$0xff] %v1723_v0  ;;  %v2063_v0 = vmul.f32 (!%p2874_p6), %v1864_v53, %v1800_v51  ;;  %v2190_v11 = vadd.f32 (!%p2874_p6), %v2126_v62, %v2062_v50  ;;  %v2128_v13 = vmul.f32 (!%p2874_p6), %v1929_v60, %v1800_v51  ;;  %2504 = vst [vmem:[%s4199_s1 + $0x8] sm:$0xff] (!%p2874_p6), %v2921_v4  ;;  %v2005_v47 = vmul.f32 (!%p2874_p6), -1.0, %v1807_v29  ;;  %v1873_v50 = vld [vmem:[%s4184_s5 + $0x88] sm:$0xff] (!%p2874_p6)  ;;  %v1875_v4 = vld [vmem:[%s4184_s5 + $0x98] sm:$0xff] (!%p2874_p6) }
 0x2a0   : > { %v2127_v12 = vmul.f32 %v1999_v63, %v1928_v59  ;;  %v2922_v18 = vpack.c.bf16 %v2252_v61, %v2251_v5  ;;  %v2253_v19 = vmul.f32 0.0625, %v2189_v6  ;;  %v2067_v32 = vmul.f32 %v1868_v17, %v1804_v15  ;;  %v1936_v59 = vld [vmem:[%s4190_s16 + $0x80] sm:$0xff]  ;;  %v1937_v60 = vld [vmem:[%s4190_s16 + $0x88] sm:$0xff]  ;;  %v1811_v61 = vld [vmem:[#allocation2 + $0x98] sm:$0xff] }
 0x2a1   : > { %v2254_v23 = vmul.f32 0.0625, %v2190_v11  ;;  %v2192_v25 = vadd.f32 %v2128_v13, %v2064_v7  ;;  %v2068_v33 = vmul.f32 %v1869_v22, %v1805_v16  ;;  %v2193_v40 = vadd.f32 %v2129_v26, %v2065_v20  ;;  %v1812_v11 = vld [vmem:[#allocation2 + $0xa0] sm:$0xff]  ;;  %v1813_v16 = vld [vmem:[#allocation2 + $0xa8] sm:$0xff] }
 0x2a2   : > { %v2191_v24 = vadd.f32 %v2127_v12, %v2063_v0  ;;  %2505 = vst [vmem:[%s4199_s1 + $0x10] sm:$0xff] %v2922_v18  ;;  %v2194_v44 = vadd.f32 %v2130_v30, %v2066_v21  ;;  %v2131_v45 = vmul.f32 %v2003_v31, %v1932_v27  ;;  %v2132_v46 = vmul.f32 %v1933_v28, %v1804_v15  ;;  %v1876_v17 = vld [vmem:[%s4184_s5 + $0xa0] sm:$0xff]  ;;  %v1877_v18 = vld [vmem:[%s4184_s5 + $0xa8] sm:$0xff] }
 0x2a3   : > { %v2923_v37 = vpack.c.bf16 %v2254_v23, %v2253_v19  ;;  %v2256_v39 = vmul.f32 0.0625, %v2192_v25  ;;  %v2257_v52 = vmul.f32 0.0625, %v2193_v40  ;;  %v2069_v53 = vmul.f32 %v1870_v35, %v1806_v34  ;;  %v1940_v27 = vld [vmem:[%s4190_s16 + $0xa0] sm:$0xff]  ;;  %v1941_v28 = vld [vmem:[%s4190_s16 + $0xa8] sm:$0xff]  ;;  %v1878_v35 = vld [vmem:[%s4184_s5 + $0xb0] sm:$0xff] }
 0x2a4   : > { %v2255_v38 = vmul.f32 0.0625, %v2191_v24  ;;  %v2070_v54 = vmul.f32 %v1871_v36, %v1807_v29  ;;  %v2258_v55 = vmul.f32 0.0625, %v2194_v44  ;;  %v2195_v56 = vadd.f32 %v2131_v45, %v2067_v32  ;;  %v1815_v29 = vld [vmem:[#allocation2 + $0xb8] sm:$0xff] }
 0x2a5   : > { %2506 = vst [vmem:[%s4199_s1 + $0x18] sm:$0xff] %v2923_v37  ;;  %v2196_v57 = vadd.f32 %v2132_v46, %v2068_v33  ;;  %v2133_v58 = vmul.f32 %v2005_v47, %v1934_v41  ;;  %v2134_v62 = vmul.f32 %v1935_v42, %v1806_v34  ;;  %v2007_v63 = vmul.f32 -1.0, %v1809_v48  ;;  %v1814_v34 = vld [vmem:[#allocation2 + $0xb0] sm:$0xff]  ;;  %v1879_v36 = vld [vmem:[%s4184_s5 + $0xb8] sm:$0xff] }
 0x2a6   : > { %v2924_v51 = vpack.c.bf16 %v2256_v39, %v2255_v38  ;;  %v2071_v0 = vmul.f32 %v1872_v49, %v1808_v43  ;;  %v2072_v1 = vmul.f32 %v1873_v50, %v1809_v48  ;;  %v2925_v5 = vpack.c.bf16 %v2258_v55, %v2257_v52  ;;  %v1942_v41 = vld [vmem:[%s4190_s16 + $0xb0] sm:$0xff]  ;;  %v1943_v42 = vld [vmem:[%s4190_s16 + $0xb8] sm:$0xff]  ;;  %v1817_v48 = vld [vmem:[#allocation2 + $0xc8] sm:$0xff] }
 0x2a7   : > { %v2259_v6 = vmul.f32 0.0625, %v2195_v56  ;;  %v2260_v7 = vmul.f32 0.0625, %v2196_v57  ;;  %v2197_v8 = vadd.f32 %v2133_v58, %v2069_v53  ;;  %v2198_v12 = vadd.f32 %v2134_v62, %v2070_v54  ;;  %v1880_v49 = vld [vmem:[%s4184_s5 + $0xc0] sm:$0xff]  ;;  %v1881_v50 = vld [vmem:[%s4184_s5 + $0xc8] sm:$0xff] }
 0x2a8   : > { %2507 = vst [vmem:[%s4199_s1 + $0x20] sm:$0xff] %v2924_v51  ;;  %v2135_v13 = vmul.f32 %v2007_v63, %v1936_v59  ;;  %v2136_v14 = vmul.f32 %v1937_v60, %v1808_v43  ;;  %v2009_v15 = vmul.f32 -1.0, %v1811_v61  ;;  %2508 = vst [vmem:[%s4199_s1 + $0x28] sm:$0xff] %v2925_v5  ;;  %v2073_v21 = vmul.f32 %v1874_v3, %v1810_v2  ;;  %v1816_v43 = vld [vmem:[#allocation2 + $0xc0] sm:$0xff]  ;;  %v1945_v60 = vld [vmem:[%s4190_s16 + $0xc8] sm:$0xff] }
 0x2a9   : > { %v2926_v19 = vpack.c.bf16 %v2260_v7, %v2259_v6  ;;  %v2261_v20 = vmul.f32 0.0625, %v2197_v8  ;;  %v2074_v22 = vmul.f32 %v1875_v4, %v1811_v61  ;;  %v2262_v23 = vmul.f32 0.0625, %v2198_v12  ;;  %v1944_v59 = vld [vmem:[%s4190_s16 + $0xc0] sm:$0xff]  ;;  %v1819_v61 = vld [vmem:[#allocation2 + $0xd8] sm:$0xff]  ;;  %v1882_v3 = vld [vmem:[%s4184_s5 + $0xd0] sm:$0xff] }
 0x2aa   : > { %v2199_v24 = vadd.f32 %v2135_v13, %v2071_v0  ;;  %v2200_v25 = vadd.f32 %v2136_v14, %v2072_v1  ;;  %v2137_v26 = vmul.f32 %v2009_v15, %v1938_v9  ;;  %v2138_v30 = vmul.f32 %v1939_v10, %v1810_v2  ;;  %v1818_v2 = vld [vmem:[#allocation2 + $0xd0] sm:$0xff]  ;;  %v1883_v4 = vld [vmem:[%s4184_s5 + $0xd8] sm:$0xff] }
 0x2ab   : > { %2509 = vst [vmem:[%s4199_s1 + $0x30] sm:$0xff] %v2926_v19  ;;  %v2011_v31 = vmul.f32 -1.0, %v1813_v16  ;;  %v2075_v32 = vmul.f32 %v1876_v17, %v1812_v11  ;;  %v2076_v33 = vmul.f32 %v1877_v18, %v1813_v16  ;;  %v2927_v37 = vpack.c.bf16 %v2262_v23, %v2261_v20  ;;  %v1946_v9 = vld [vmem:[%s4190_s16 + $0xd0] sm:$0xff]  ;;  %v1947_v10 = vld [vmem:[%s4190_s16 + $0xd8] sm:$0xff]  ;;  %v1821_v16 = vld [vmem:[#allocation2 + $0xe8] sm:$0xff] }
 0x2ac   : > { %v2263_v38 = vmul.f32 0.0625, %v2199_v24  ;;  %v2264_v39 = vmul.f32 0.0625, %v2200_v25  ;;  %v2201_v40 = vadd.f32 %v2137_v26, %v2073_v21  ;;  %v2202_v44 = vadd.f32 %v2138_v30, %v2074_v22  ;;  %v1884_v17 = vld [vmem:[%s4184_s5 + $0xe0] sm:$0xff]  ;;  %v1885_v18 = vld [vmem:[%s4184_s5 + $0xe8] sm:$0xff] }
 0x2ad   : > { %v2139_v45 = vmul.f32 %v2011_v31, %v1940_v27  ;;  %v2140_v46 = vmul.f32 %v1941_v28, %v1812_v11  ;;  %v2013_v47 = vmul.f32 -1.0, %v1815_v29  ;;  %2510 = vst [vmem:[%s4199_s1 + $0x38] sm:$0xff] %v2927_v37  ;;  %v2077_v53 = vmul.f32 %v1878_v35, %v1814_v34  ;;  %v1820_v11 = vld [vmem:[#allocation2 + $0xe0] sm:$0xff]  ;;  %v1949_v28 = vld [vmem:[%s4190_s16 + $0xe8] sm:$0xff]  ;;  %v1886_v35 = vld [vmem:[%s4184_s5 + $0xf0] sm:$0xff] }
 0x2ae   : > { %v2928_v51 = vpack.c.bf16 %v2264_v39, %v2263_v38  ;;  %v2265_v52 = vmul.f32 0.0625, %v2201_v40  ;;  %v2078_v54 = vmul.f32 %v1879_v36, %v1815_v29  ;;  %v2266_v55 = vmul.f32 0.0625, %v2202_v44  ;;  %v1948_v27 = vld [vmem:[%s4190_s16 + $0xe0] sm:$0xff]  ;;  %v1823_v29 = vld [vmem:[#allocation2 + $0xf8] sm:$0xff] }
 0x2af   : > { %v2203_v56 = vadd.f32 %v2139_v45, %v2075_v32  ;;  %v2204_v57 = vadd.f32 %v2140_v46, %v2076_v33  ;;  %v2141_v58 = vmul.f32 %v2013_v47, %v1942_v41  ;;  %v2142_v62 = vmul.f32 %v1943_v42, %v1814_v34  ;;  %v1822_v34 = vld [vmem:[#allocation2 + $0xf0] sm:$0xff]  ;;  %v1887_v36 = vld [vmem:[%s4184_s5 + $0xf8] sm:$0xff] }
 0x2b0   : > { %2511 = vst [vmem:[%s4199_s1 + $0x40] sm:$0xff] %v2928_v51  ;;  %v2015_v63 = vmul.f32 -1.0, %v1817_v48  ;;  %v2079_v0 = vmul.f32 %v1880_v49, %v1816_v43  ;;  %v2080_v1 = vmul.f32 %v1881_v50, %v1817_v48  ;;  %v2929_v5 = vpack.c.bf16 %v2266_v55, %v2265_v52  ;;  %v1950_v41 = vld [vmem:[%s4190_s16 + $0xf0] sm:$0xff]  ;;  %v1951_v42 = vld [vmem:[%s4190_s16 + $0xf8] sm:$0xff]  ;;  %v1825_v48 = vld [vmem:[#allocation2 + $0x108] sm:$0xff] }
 0x2b1   : > { %v2267_v6 = vmul.f32 0.0625, %v2203_v56  ;;  %v2268_v7 = vmul.f32 0.0625, %v2204_v57  ;;  %v2205_v8 = vadd.f32 %v2141_v58, %v2077_v53  ;;  %v2206_v12 = vadd.f32 %v2142_v62, %v2078_v54  ;;  %v1888_v49 = vld [vmem:[%s4184_s5 + $0x100] sm:$0xff]  ;;  %v1889_v50 = vld [vmem:[%s4184_s5 + $0x108] sm:$0xff] }
 0x2b2   : > { %v2143_v13 = vmul.f32 %v2015_v63, %v1944_v59  ;;  %v2144_v14 = vmul.f32 %v1945_v60, %v1816_v43  ;;  %v2017_v15 = vmul.f32 -1.0, %v1819_v61  ;;  %2512 = vst [vmem:[%s4199_s1 + $0x48] sm:$0xff] %v2929_v5  ;;  %v2081_v21 = vmul.f32 %v1882_v3, %v1818_v2  ;;  %v1824_v43 = vld [vmem:[#allocation2 + $0x100] sm:$0xff]  ;;  %v1953_v60 = vld [vmem:[%s4190_s16 + $0x108] sm:$0xff]  ;;  %v1890_v3 = vld [vmem:[%s4184_s5 + $0x110] sm:$0xff] }
 0x2b3   : > { %v2930_v19 = vpack.c.bf16 %v2268_v7, %v2267_v6  ;;  %v2269_v20 = vmul.f32 0.0625, %v2205_v8  ;;  %v2082_v22 = vmul.f32 %v1883_v4, %v1819_v61  ;;  %v2270_v23 = vmul.f32 0.0625, %v2206_v12  ;;  %v1952_v59 = vld [vmem:[%s4190_s16 + $0x100] sm:$0xff]  ;;  %v1827_v61 = vld [vmem:[#allocation2 + $0x118] sm:$0xff] }
 0x2b4   : > { %v2207_v24 = vadd.f32 %v2143_v13, %v2079_v0  ;;  %v2208_v25 = vadd.f32 %v2144_v14, %v2080_v1  ;;  %v2145_v26 = vmul.f32 %v2017_v15, %v1946_v9  ;;  %v2146_v30 = vmul.f32 %v1947_v10, %v1818_v2  ;;  %v1826_v2 = vld [vmem:[#allocation2 + $0x110] sm:$0xff]  ;;  %v1891_v4 = vld [vmem:[%s4184_s5 + $0x118] sm:$0xff] }
 0x2b5   : > { %2513 = vst [vmem:[%s4199_s1 + $0x50] sm:$0xff] %v2930_v19  ;;  %v2019_v31 = vmul.f32 -1.0, %v1821_v16  ;;  %v2083_v32 = vmul.f32 %v1884_v17, %v1820_v11  ;;  %v2084_v33 = vmul.f32 %v1885_v18, %v1821_v16  ;;  %v2931_v37 = vpack.c.bf16 %v2270_v23, %v2269_v20  ;;  %v1954_v9 = vld [vmem:[%s4190_s16 + $0x110] sm:$0xff]  ;;  %v1955_v10 = vld [vmem:[%s4190_s16 + $0x118] sm:$0xff]  ;;  %v1829_v16 = vld [vmem:[#allocation2 + $0x128] sm:$0xff] }
 0x2b6   : > { %v2271_v38 = vmul.f32 0.0625, %v2207_v24  ;;  %v2272_v39 = vmul.f32 0.0625, %v2208_v25  ;;  %v2209_v40 = vadd.f32 %v2145_v26, %v2081_v21  ;;  %v2210_v44 = vadd.f32 %v2146_v30, %v2082_v22  ;;  %v1892_v17 = vld [vmem:[%s4184_s5 + $0x120] sm:$0xff]  ;;  %v1893_v18 = vld [vmem:[%s4184_s5 + $0x128] sm:$0xff] }
 0x2b7   : > { %v2147_v45 = vmul.f32 %v2019_v31, %v1948_v27  ;;  %v2148_v46 = vmul.f32 %v1949_v28, %v1820_v11  ;;  %v2021_v47 = vmul.f32 -1.0, %v1823_v29  ;;  %2514 = vst [vmem:[%s4199_s1 + $0x58] sm:$0xff] %v2931_v37  ;;  %v2085_v53 = vmul.f32 %v1886_v35, %v1822_v34  ;;  %v1828_v11 = vld [vmem:[#allocation2 + $0x120] sm:$0xff]  ;;  %v1957_v28 = vld [vmem:[%s4190_s16 + $0x128] sm:$0xff]  ;;  %v1894_v35 = vld [vmem:[%s4184_s5 + $0x130] sm:$0xff] }
 0x2b8   : > { %v2932_v51 = vpack.c.bf16 %v2272_v39, %v2271_v38  ;;  %v2273_v52 = vmul.f32 0.0625, %v2209_v40  ;;  %v2086_v54 = vmul.f32 %v1887_v36, %v1823_v29  ;;  %v2274_v55 = vmul.f32 0.0625, %v2210_v44  ;;  %v1956_v27 = vld [vmem:[%s4190_s16 + $0x120] sm:$0xff]  ;;  %v1831_v29 = vld [vmem:[#allocation2 + $0x138] sm:$0xff] }
 0x2b9   : > { %v2211_v56 = vadd.f32 %v2147_v45, %v2083_v32  ;;  %v2212_v57 = vadd.f32 %v2148_v46, %v2084_v33  ;;  %v2149_v58 = vmul.f32 %v2021_v47, %v1950_v41  ;;  %v2150_v62 = vmul.f32 %v1951_v42, %v1822_v34  ;;  %v1830_v34 = vld [vmem:[#allocation2 + $0x130] sm:$0xff]  ;;  %v1895_v36 = vld [vmem:[%s4184_s5 + $0x138] sm:$0xff] }
 0x2ba   : > { %2515 = vst [vmem:[%s4199_s1 + $0x60] sm:$0xff] %v2932_v51  ;;  %v2023_v63 = vmul.f32 -1.0, %v1825_v48  ;;  %v2087_v0 = vmul.f32 %v1888_v49, %v1824_v43  ;;  %v2088_v1 = vmul.f32 %v1889_v50, %v1825_v48  ;;  %v2933_v5 = vpack.c.bf16 %v2274_v55, %v2273_v52  ;;  %v1958_v41 = vld [vmem:[%s4190_s16 + $0x130] sm:$0xff]  ;;  %v1959_v42 = vld [vmem:[%s4190_s16 + $0x138] sm:$0xff]  ;;  %v1833_v48 = vld [vmem:[#allocation2 + $0x148] sm:$0xff] }
 0x2bb   : > { %v2275_v6 = vmul.f32 0.0625, %v2211_v56  ;;  %v2276_v7 = vmul.f32 0.0625, %v2212_v57  ;;  %v2213_v8 = vadd.f32 %v2149_v58, %v2085_v53  ;;  %v2214_v12 = vadd.f32 %v2150_v62, %v2086_v54  ;;  %v1896_v49 = vld [vmem:[%s4184_s5 + $0x140] sm:$0xff]  ;;  %v1897_v50 = vld [vmem:[%s4184_s5 + $0x148] sm:$0xff] }
 0x2bc   : > { %v2151_v13 = vmul.f32 %v2023_v63, %v1952_v59  ;;  %v2152_v14 = vmul.f32 %v1953_v60, %v1824_v43  ;;  %v2025_v15 = vmul.f32 -1.0, %v1827_v61  ;;  %2516 = vst [vmem:[%s4199_s1 + $0x68] sm:$0xff] %v2933_v5  ;;  %v2089_v21 = vmul.f32 %v1890_v3, %v1826_v2  ;;  %v1832_v43 = vld [vmem:[#allocation2 + $0x140] sm:$0xff]  ;;  %v1961_v60 = vld [vmem:[%s4190_s16 + $0x148] sm:$0xff]  ;;  %v1898_v3 = vld [vmem:[%s4184_s5 + $0x150] sm:$0xff] }
 0x2bd   : > { %v2934_v19 = vpack.c.bf16 %v2276_v7, %v2275_v6  ;;  %v2277_v20 = vmul.f32 0.0625, %v2213_v8  ;;  %v2090_v22 = vmul.f32 %v1891_v4, %v1827_v61  ;;  %v2278_v23 = vmul.f32 0.0625, %v2214_v12  ;;  %v1960_v59 = vld [vmem:[%s4190_s16 + $0x140] sm:$0xff]  ;;  %v1835_v61 = vld [vmem:[#allocation2 + $0x158] sm:$0xff] }
 0x2be   : > { %v2215_v24 = vadd.f32 %v2151_v13, %v2087_v0  ;;  %v2216_v25 = vadd.f32 %v2152_v14, %v2088_v1  ;;  %v2153_v26 = vmul.f32 %v2025_v15, %v1954_v9  ;;  %v2154_v30 = vmul.f32 %v1955_v10, %v1826_v2  ;;  %v1834_v2 = vld [vmem:[#allocation2 + $0x150] sm:$0xff]  ;;  %v1899_v4 = vld [vmem:[%s4184_s5 + $0x158] sm:$0xff] }
 0x2bf   : > { %2517 = vst [vmem:[%s4199_s1 + $0x70] sm:$0xff] %v2934_v19  ;;  %v2027_v31 = vmul.f32 -1.0, %v1829_v16  ;;  %v2091_v32 = vmul.f32 %v1892_v17, %v1828_v11  ;;  %v2092_v33 = vmul.f32 %v1893_v18, %v1829_v16  ;;  %v2935_v37 = vpack.c.bf16 %v2278_v23, %v2277_v20  ;;  %v1962_v9 = vld [vmem:[%s4190_s16 + $0x150] sm:$0xff]  ;;  %v1963_v10 = vld [vmem:[%s4190_s16 + $0x158] sm:$0xff]  ;;  %v1837_v16 = vld [vmem:[#allocation2 + $0x168] sm:$0xff] }
 0x2c0   : > { %v2279_v38 = vmul.f32 0.0625, %v2215_v24  ;;  %v2280_v39 = vmul.f32 0.0625, %v2216_v25  ;;  %v2217_v40 = vadd.f32 %v2153_v26, %v2089_v21  ;;  %v2218_v44 = vadd.f32 %v2154_v30, %v2090_v22  ;;  %v1900_v17 = vld [vmem:[%s4184_s5 + $0x160] sm:$0xff]  ;;  %v1901_v18 = vld [vmem:[%s4184_s5 + $0x168] sm:$0xff] }
 0x2c1   : > { %v2155_v45 = vmul.f32 %v2027_v31, %v1956_v27  ;;  %v2156_v46 = vmul.f32 %v1957_v28, %v1828_v11  ;;  %v2029_v47 = vmul.f32 -1.0, %v1831_v29  ;;  %2518 = vst [vmem:[%s4199_s1 + $0x78] sm:$0xff] %v2935_v37  ;;  %v2093_v53 = vmul.f32 %v1894_v35, %v1830_v34  ;;  %v1836_v11 = vld [vmem:[#allocation2 + $0x160] sm:$0xff]  ;;  %v1965_v28 = vld [vmem:[%s4190_s16 + $0x168] sm:$0xff]  ;;  %v1902_v35 = vld [vmem:[%s4184_s5 + $0x170] sm:$0xff] }
 0x2c2   : > { %v2936_v51 = vpack.c.bf16 %v2280_v39, %v2279_v38  ;;  %v2281_v52 = vmul.f32 0.0625, %v2217_v40  ;;  %v2094_v54 = vmul.f32 %v1895_v36, %v1831_v29  ;;  %v2282_v55 = vmul.f32 0.0625, %v2218_v44  ;;  %v1964_v27 = vld [vmem:[%s4190_s16 + $0x160] sm:$0xff]  ;;  %v1839_v29 = vld [vmem:[#allocation2 + $0x178] sm:$0xff] }
 0x2c3   : > { %v2219_v56 = vadd.f32 %v2155_v45, %v2091_v32  ;;  %v2220_v57 = vadd.f32 %v2156_v46, %v2092_v33  ;;  %v2157_v58 = vmul.f32 %v2029_v47, %v1958_v41  ;;  %v2158_v62 = vmul.f32 %v1959_v42, %v1830_v34  ;;  %v1838_v34 = vld [vmem:[#allocation2 + $0x170] sm:$0xff]  ;;  %v1903_v36 = vld [vmem:[%s4184_s5 + $0x178] sm:$0xff] }
 0x2c4   : > { %2519 = vst [vmem:[%s4199_s1 + $0x80] sm:$0xff] %v2936_v51  ;;  %v2031_v63 = vmul.f32 -1.0, %v1833_v48  ;;  %v2095_v0 = vmul.f32 %v1896_v49, %v1832_v43  ;;  %v2096_v1 = vmul.f32 %v1897_v50, %v1833_v48  ;;  %v2937_v5 = vpack.c.bf16 %v2282_v55, %v2281_v52  ;;  %v1966_v41 = vld [vmem:[%s4190_s16 + $0x170] sm:$0xff]  ;;  %v1967_v42 = vld [vmem:[%s4190_s16 + $0x178] sm:$0xff]  ;;  %v1841_v48 = vld [vmem:[#allocation2 + $0x188] sm:$0xff] }
 0x2c5   : > { %v2283_v6 = vmul.f32 0.0625, %v2219_v56  ;;  %v2284_v7 = vmul.f32 0.0625, %v2220_v57  ;;  %v2221_v8 = vadd.f32 %v2157_v58, %v2093_v53  ;;  %v2222_v12 = vadd.f32 %v2158_v62, %v2094_v54  ;;  %v1904_v49 = vld [vmem:[%s4184_s5 + $0x180] sm:$0xff]  ;;  %v1905_v50 = vld [vmem:[%s4184_s5 + $0x188] sm:$0xff] }
 0x2c6   : > { %v2159_v13 = vmul.f32 %v2031_v63, %v1960_v59  ;;  %v2160_v14 = vmul.f32 %v1961_v60, %v1832_v43  ;;  %v2033_v15 = vmul.f32 -1.0, %v1835_v61  ;;  %2520 = vst [vmem:[%s4199_s1 + $0x88] sm:$0xff] %v2937_v5  ;;  %v2097_v21 = vmul.f32 %v1898_v3, %v1834_v2  ;;  %v1840_v43 = vld [vmem:[#allocation2 + $0x180] sm:$0xff]  ;;  %v1969_v60 = vld [vmem:[%s4190_s16 + $0x188] sm:$0xff]  ;;  %v1906_v3 = vld [vmem:[%s4184_s5 + $0x190] sm:$0xff] }
 0x2c7   : > { %v2938_v19 = vpack.c.bf16 %v2284_v7, %v2283_v6  ;;  %v2285_v20 = vmul.f32 0.0625, %v2221_v8  ;;  %v2098_v22 = vmul.f32 %v1899_v4, %v1835_v61  ;;  %v2286_v23 = vmul.f32 0.0625, %v2222_v12  ;;  %v1968_v59 = vld [vmem:[%s4190_s16 + $0x180] sm:$0xff]  ;;  %v1843_v61 = vld [vmem:[#allocation2 + $0x198] sm:$0xff] }
 0x2c8   : > { %v2223_v24 = vadd.f32 %v2159_v13, %v2095_v0  ;;  %v2224_v25 = vadd.f32 %v2160_v14, %v2096_v1  ;;  %v2161_v26 = vmul.f32 %v2033_v15, %v1962_v9  ;;  %v2162_v30 = vmul.f32 %v1963_v10, %v1834_v2  ;;  %v1842_v2 = vld [vmem:[#allocation2 + $0x190] sm:$0xff]  ;;  %v1907_v4 = vld [vmem:[%s4184_s5 + $0x198] sm:$0xff] }
 0x2c9   : > { %2521 = vst [vmem:[%s4199_s1 + $0x90] sm:$0xff] %v2938_v19  ;;  %v2035_v31 = vmul.f32 -1.0, %v1837_v16  ;;  %v2099_v32 = vmul.f32 %v1900_v17, %v1836_v11  ;;  %v2100_v33 = vmul.f32 %v1901_v18, %v1837_v16  ;;  %v2939_v37 = vpack.c.bf16 %v2286_v23, %v2285_v20  ;;  %v1970_v9 = vld [vmem:[%s4190_s16 + $0x190] sm:$0xff]  ;;  %v1971_v10 = vld [vmem:[%s4190_s16 + $0x198] sm:$0xff]  ;;  %v1845_v16 = vld [vmem:[#allocation2 + $0x1a8] sm:$0xff] }
 0x2ca   : > { %v2287_v38 = vmul.f32 0.0625, %v2223_v24  ;;  %v2288_v39 = vmul.f32 0.0625, %v2224_v25  ;;  %v2225_v40 = vadd.f32 %v2161_v26, %v2097_v21  ;;  %v2226_v44 = vadd.f32 %v2162_v30, %v2098_v22  ;;  %v1908_v17 = vld [vmem:[%s4184_s5 + $0x1a0] sm:$0xff]  ;;  %v1909_v18 = vld [vmem:[%s4184_s5 + $0x1a8] sm:$0xff] }
 0x2cb   : > { %v2163_v45 = vmul.f32 %v2035_v31, %v1964_v27  ;;  %v2164_v46 = vmul.f32 %v1965_v28, %v1836_v11  ;;  %v2037_v47 = vmul.f32 -1.0, %v1839_v29  ;;  %2522 = vst [vmem:[%s4199_s1 + $0x98] sm:$0xff] %v2939_v37  ;;  %v2101_v53 = vmul.f32 %v1902_v35, %v1838_v34  ;;  %v1844_v11 = vld [vmem:[#allocation2 + $0x1a0] sm:$0xff]  ;;  %v1973_v28 = vld [vmem:[%s4190_s16 + $0x1a8] sm:$0xff]  ;;  %v1910_v35 = vld [vmem:[%s4184_s5 + $0x1b0] sm:$0xff] }
 0x2cc   : > { %v2940_v51 = vpack.c.bf16 %v2288_v39, %v2287_v38  ;;  %v2289_v52 = vmul.f32 0.0625, %v2225_v40  ;;  %v2102_v54 = vmul.f32 %v1903_v36, %v1839_v29  ;;  %v2290_v55 = vmul.f32 0.0625, %v2226_v44  ;;  %v1972_v27 = vld [vmem:[%s4190_s16 + $0x1a0] sm:$0xff]  ;;  %v1847_v29 = vld [vmem:[#allocation2 + $0x1b8] sm:$0xff] }
 0x2cd   : > { %v2227_v56 = vadd.f32 %v2163_v45, %v2099_v32  ;;  %v2228_v57 = vadd.f32 %v2164_v46, %v2100_v33  ;;  %v2165_v58 = vmul.f32 %v2037_v47, %v1966_v41  ;;  %v2166_v62 = vmul.f32 %v1967_v42, %v1838_v34  ;;  %v1846_v34 = vld [vmem:[#allocation2 + $0x1b0] sm:$0xff]  ;;  %v1911_v36 = vld [vmem:[%s4184_s5 + $0x1b8] sm:$0xff] }
 0x2ce   : > { %2523 = vst [vmem:[%s4199_s1 + $0xa0] sm:$0xff] %v2940_v51  ;;  %v2039_v63 = vmul.f32 -1.0, %v1841_v48  ;;  %v2103_v0 = vmul.f32 %v1904_v49, %v1840_v43  ;;  %v2104_v1 = vmul.f32 %v1905_v50, %v1841_v48  ;;  %v2941_v5 = vpack.c.bf16 %v2290_v55, %v2289_v52  ;;  %v1974_v41 = vld [vmem:[%s4190_s16 + $0x1b0] sm:$0xff]  ;;  %v1975_v42 = vld [vmem:[%s4190_s16 + $0x1b8] sm:$0xff]  ;;  %v1849_v48 = vld [vmem:[#allocation2 + $0x1c8] sm:$0xff] }
 0x2cf   : > { %v2291_v6 = vmul.f32 0.0625, %v2227_v56  ;;  %v2292_v7 = vmul.f32 0.0625, %v2228_v57  ;;  %v2229_v8 = vadd.f32 %v2165_v58, %v2101_v53  ;;  %v2230_v12 = vadd.f32 %v2166_v62, %v2102_v54  ;;  %v1912_v49 = vld [vmem:[%s4184_s5 + $0x1c0] sm:$0xff]  ;;  %v1913_v50 = vld [vmem:[%s4184_s5 + $0x1c8] sm:$0xff] }
 0x2d0   : > { %v2167_v13 = vmul.f32 %v2039_v63, %v1968_v59  ;;  %v2168_v14 = vmul.f32 %v1969_v60, %v1840_v43  ;;  %v2041_v15 = vmul.f32 -1.0, %v1843_v61  ;;  %2524 = vst [vmem:[%s4199_s1 + $0xa8] sm:$0xff] %v2941_v5  ;;  %v2105_v21 = vmul.f32 %v1906_v3, %v1842_v2  ;;  %v1848_v43 = vld [vmem:[#allocation2 + $0x1c0] sm:$0xff]  ;;  %v1977_v60 = vld [vmem:[%s4190_s16 + $0x1c8] sm:$0xff]  ;;  %v1914_v3 = vld [vmem:[%s4184_s5 + $0x1d0] sm:$0xff] }
 0x2d1   : > { %v2942_v19 = vpack.c.bf16 %v2292_v7, %v2291_v6  ;;  %v2293_v20 = vmul.f32 0.0625, %v2229_v8  ;;  %v2106_v22 = vmul.f32 %v1907_v4, %v1843_v61  ;;  %v2294_v23 = vmul.f32 0.0625, %v2230_v12  ;;  %v1976_v59 = vld [vmem:[%s4190_s16 + $0x1c0] sm:$0xff]  ;;  %v1851_v61 = vld [vmem:[#allocation2 + $0x1d8] sm:$0xff] }
 0x2d2   : > { %v2231_v24 = vadd.f32 %v2167_v13, %v2103_v0  ;;  %v2232_v25 = vadd.f32 %v2168_v14, %v2104_v1  ;;  %v2169_v26 = vmul.f32 %v2041_v15, %v1970_v9  ;;  %v2170_v30 = vmul.f32 %v1971_v10, %v1842_v2  ;;  %v1850_v2 = vld [vmem:[#allocation2 + $0x1d0] sm:$0xff]  ;;  %v1915_v4 = vld [vmem:[%s4184_s5 + $0x1d8] sm:$0xff] }
 0x2d3   : > { %2525 = vst [vmem:[%s4199_s1 + $0xb0] sm:$0xff] %v2942_v19  ;;  %v2043_v31 = vmul.f32 -1.0, %v1845_v16  ;;  %v2107_v32 = vmul.f32 %v1908_v17, %v1844_v11  ;;  %v2108_v33 = vmul.f32 %v1909_v18, %v1845_v16  ;;  %v2943_v37 = vpack.c.bf16 %v2294_v23, %v2293_v20  ;;  %v1978_v9 = vld [vmem:[%s4190_s16 + $0x1d0] sm:$0xff]  ;;  %v1979_v10 = vld [vmem:[%s4190_s16 + $0x1d8] sm:$0xff]  ;;  %v1853_v16 = vld [vmem:[#allocation2 + $0x1e8] sm:$0xff] }
 0x2d4   : > { %v2295_v38 = vmul.f32 0.0625, %v2231_v24  ;;  %v2296_v39 = vmul.f32 0.0625, %v2232_v25  ;;  %v2233_v40 = vadd.f32 %v2169_v26, %v2105_v21  ;;  %v2234_v44 = vadd.f32 %v2170_v30, %v2106_v22  ;;  %v1916_v17 = vld [vmem:[%s4184_s5 + $0x1e0] sm:$0xff]  ;;  %v1917_v18 = vld [vmem:[%s4184_s5 + $0x1e8] sm:$0xff] }
 0x2d5   : > { %v2171_v45 = vmul.f32 %v2043_v31, %v1972_v27  ;;  %v2172_v46 = vmul.f32 %v1973_v28, %v1844_v11  ;;  %v2045_v47 = vmul.f32 -1.0, %v1847_v29  ;;  %2526 = vst [vmem:[%s4199_s1 + $0xb8] sm:$0xff] %v2943_v37  ;;  %v2109_v53 = vmul.f32 %v1910_v35, %v1846_v34  ;;  %v1852_v11 = vld [vmem:[#allocation2 + $0x1e0] sm:$0xff]  ;;  %v1981_v28 = vld [vmem:[%s4190_s16 + $0x1e8] sm:$0xff]  ;;  %v1918_v35 = vld [vmem:[%s4184_s5 + $0x1f0] sm:$0xff] }
 0x2d6   : > { %v2944_v51 = vpack.c.bf16 %v2296_v39, %v2295_v38  ;;  %v2297_v52 = vmul.f32 0.0625, %v2233_v40  ;;  %v2110_v54 = vmul.f32 %v1911_v36, %v1847_v29  ;;  %v2298_v55 = vmul.f32 0.0625, %v2234_v44  ;;  %v1980_v27 = vld [vmem:[%s4190_s16 + $0x1e0] sm:$0xff]  ;;  %v1855_v29 = vld [vmem:[#allocation2 + $0x1f8] sm:$0xff] }
 0x2d7   : > { %v2235_v56 = vadd.f32 %v2171_v45, %v2107_v32  ;;  %v2236_v57 = vadd.f32 %v2172_v46, %v2108_v33  ;;  %v2173_v58 = vmul.f32 %v2045_v47, %v1974_v41  ;;  %v2174_v62 = vmul.f32 %v1975_v42, %v1846_v34  ;;  %v1854_v34 = vld [vmem:[#allocation2 + $0x1f0] sm:$0xff]  ;;  %v1919_v36 = vld [vmem:[%s4184_s5 + $0x1f8] sm:$0xff] }
 0x2d8   : > { %2527 = vst [vmem:[%s4199_s1 + $0xc0] sm:$0xff] %v2944_v51  ;;  %v2047_v63 = vmul.f32 -1.0, %v1849_v48  ;;  %v2111_v0 = vmul.f32 %v1912_v49, %v1848_v43  ;;  %v2112_v1 = vmul.f32 %v1913_v50, %v1849_v48  ;;  %v2945_v5 = vpack.c.bf16 %v2298_v55, %v2297_v52  ;;  %v1982_v41 = vld [vmem:[%s4190_s16 + $0x1f0] sm:$0xff]  ;;  %v1983_v45 = vld [vmem:[%s4190_s16 + $0x1f8] sm:$0xff] }
 0x2d9   : > { %v2299_v6 = vmul.f32 0.0625, %v2235_v56  ;;  %v2300_v7 = vmul.f32 0.0625, %v2236_v57  ;;  %v2237_v8 = vadd.f32 %v2173_v58, %v2109_v53  ;;  %v2238_v12 = vadd.f32 %v2174_v62, %v2110_v54 }
 0x2da   : > { %v2175_v13 = vmul.f32 %v2047_v63, %v1976_v59  ;;  %v2176_v14 = vmul.f32 %v1977_v60, %v1848_v43  ;;  %v2049_v15 = vmul.f32 -1.0, %v1851_v61  ;;  %2528 = vst [vmem:[%s4199_s1 + $0xc8] sm:$0xff] %v2945_v5  ;;  %v2113_v21 = vmul.f32 %v1914_v3, %v1850_v2 }
 0x2db   : > { %v2946_v19 = vpack.c.bf16 %v2300_v7, %v2299_v6  ;;  %v2301_v20 = vmul.f32 0.0625, %v2237_v8  ;;  %v2114_v22 = vmul.f32 %v1915_v4, %v1851_v61  ;;  %v2302_v23 = vmul.f32 0.0625, %v2238_v12 }
 0x2dc   : > { %v2239_v24 = vadd.f32 %v2175_v13, %v2111_v0  ;;  %v2240_v25 = vadd.f32 %v2176_v14, %v2112_v1  ;;  %v2177_v26 = vmul.f32 %v2049_v15, %v1978_v9  ;;  %v2178_v30 = vmul.f32 %v1979_v10, %v1850_v2 }
 0x2dd   : > { %2529 = vst [vmem:[%s4199_s1 + $0xd0] sm:$0xff] %v2946_v19  ;;  %v2051_v31 = vmul.f32 -1.0, %v1853_v16  ;;  %v2115_v32 = vmul.f32 %v1916_v17, %v1852_v11  ;;  %v2116_v33 = vmul.f32 %v1917_v18, %v1853_v16  ;;  %v2947_v37 = vpack.c.bf16 %v2302_v23, %v2301_v20 }
 0x2de   : > { %v2303_v38 = vmul.f32 0.0625, %v2239_v24  ;;  %v2304_v39 = vmul.f32 0.0625, %v2240_v25  ;;  %v2241_v40 = vadd.f32 %v2177_v26, %v2113_v21  ;;  %v2242_v42 = vadd.f32 %v2178_v30, %v2114_v22 }
 0x2df   : > { %v2179_v43 = vmul.f32 %v2051_v31, %v1980_v27  ;;  %v2180_v44 = vmul.f32 %v1981_v28, %v1852_v11  ;;  %v2053_v46 = vmul.f32 -1.0, %v1855_v29  ;;  %2530 = vst [vmem:[%s4199_s1 + $0xd8] sm:$0xff] %v2947_v37  ;;  %v2117_v49 = vmul.f32 %v1918_v35, %v1854_v34 }
 0x2e0   : > { %v2948_v47 = vpack.c.bf16 %v2304_v39, %v2303_v38  ;;  %v2305_v48 = vmul.f32 0.0625, %v2241_v40  ;;  %v2118_v50 = vmul.f32 %v1919_v36, %v1855_v29  ;;  %v2306_v51 = vmul.f32 0.0625, %v2242_v42 }
 0x2e1   : > { %v2243_v52 = vadd.f32 %v2179_v43, %v2115_v32  ;;  %v2244_v53 = vadd.f32 %v2180_v44, %v2116_v33  ;;  %v2181_v54 = vmul.f32 %v2053_v46, %v1982_v41  ;;  %v2182_v55 = vmul.f32 %v1983_v45, %v1854_v34 }
 0x2e2   : > { %2531 = vst [vmem:[%s4199_s1 + $0xe0] sm:$0xff] %v2948_v47  ;;  %v2949_v56 = vpack.c.bf16 %v2306_v51, %v2305_v48 }
 0x2e3   : > { %v2307_v57 = vmul.f32 0.0625, %v2243_v52  ;;  %v2308_v58 = vmul.f32 0.0625, %v2244_v53  ;;  %v2245_v59 = vadd.f32 %v2181_v54, %v2117_v49  ;;  %v2246_v60 = vadd.f32 %v2182_v55, %v2118_v50 }
 0x2e4   : > { %2532 = vst [vmem:[%s4199_s1 + $0xe8] sm:$0xff] %v2949_v56 }
 0x2e5   : > { %v2950_v61 = vpack.c.bf16 %v2308_v58, %v2307_v57  ;;  %v2309_v62 = vmul.f32 0.0625, %v2245_v59  ;;  %v2310_v63 = vmul.f32 0.0625, %v2246_v60 }
 0x2e7   : > { %2533 = vst [vmem:[%s4199_s1 + $0xf0] sm:$0xff] %v2950_v61  ;;  %v2951_v0 = vpack.c.bf16 %v2310_v63, %v2309_v62 }
 0x2e9   : > { %2534 = vst [vmem:[%s4199_s1 + $0xf8] sm:$0xff] %v2951_v0 }
 0x2ea PF: > { %s4750_s10 = sld [smem:[#allocation24_spill]]  ;;  %s4751_s15 = sld [smem:[#allocation25_spill]] }
 0x2eb   : > { %s4753_s12 = sld [smem:[#allocation30_spill]]  ;;  %s2552_s11 = sshll.u32 %s4199_s1, 4  ;;  %s4558_s11 = int_to_ptr.vmem [resolvable:$true] %s2552_s11 }
 0x2ec   : > { %s4754_s8 = sld [smem:[#allocation39_spill]]  ;;  %s4567_s0 = scalar_lea.sflag [#allocation5], %s363_s2 }
 0x2ed   : > { %s3519_s18 = scalar_lea.vmem %s4558_s11, 4096  ;;  %s3729_s1 = smov [#allocation11]  }
 0x2ee   : > { %p3520_p7 = scmp.ne.s32.totalorder %s4558_s11, %s3519_s18  ;;  %s3523_s24 = sshll.u32 %s3729_s1, 4  ;;  %s3524_s24 = int_to_ptr.vmem [resolvable:$false] %s3523_s24 }
 0x2ef   : > { %s3525_s29 = scalar_lea.vmem %s3524_s24, 8192  ;;  %p3526_p1 = scmp.lt.s32.totalorder %s4558_s11, %s3524_s24 }
 0x2f0   : > { %s2909_s27 = sshll.u32 %s4750_s10, 1  ;;  %s2952_s28 = sshll.u32 %s4751_s15, 8 }
 0x2f1   : > { %s2549_s22 = sadd.s32 %s2952_s28, %s2909_s27  ;;  %p4755_p8 = scmp.ne.s32.totalorder %s4753_s12, 0 }
 0x2f2   : > { %s2911_s23 = sshll.u32 %s2549_s22, 6  ;;  %p3527_p9 = scmp.lt.s32.totalorder %s3525_s29, %s3519_s18 }
 0x2f3   : > { %s4563_s16 = scalar_lea.hbm %s4754_s8, %s2911_s23  ;;  %p3521_p12 = pnand %p3520_p7, %p4755_p8 }
 0x2f4   : > { %p3528_p13 = por %p3527_p9, %p3526_p1 }
 0x2f5   : > { %p3522_p3 = pneg %p3521_p12 }
 0x2f7   : > { %p3529_p2 = pnand %p3528_p13, %p3522_p3 }
 0x2f9   : > { %3532 = shalt.err (!%p3529_p2)
}
 0x2fa   : > { %s3533_s2 = scalar_lea.hbm %s4563_s16, 4096  ;;  %s3537_s4 = scalar_lea.hbm %s4754_s8, 65536 }
 0x2fb   : > { %p3534_p4 = scmp.ne.s32.totalorder %s4563_s16, %s3533_s2  ;;  %p3538_p0 = scmp.lt.u32.totalorder %s4563_s16, %s4754_s8 }
 0x2fc   : > { %p3539_p10 = scmp.lt.u32.totalorder %s3537_s4, %s3533_s2  ;;  %p3541_p7 = scmp.lt.u32.totalorder %s3533_s2, %s4563_s16 }
 0x2fd   : > { %p3535_p5 = pnand %p3534_p4, %p4755_p8 }
 0x2fe   : > { %p3540_p6 = por %p3539_p10, %p3538_p0 }
 0x2ff   : > { %p3536_p11 = pneg %p3535_p5 }
 0x300   : > { %p3542_p12 = por %p3541_p7, %p3540_p6 }
 0x302   : > { %p3543_p3 = pnand %p3542_p12, %p3536_p11 }
 0x304   : > { %3546 = shalt.err (!%p3543_p3)
}
 0x305   : > { %s3730_s22 = smov 128   ;;  %s3731_s23 = smov 512  }
 0x306   : > { %s3732_s21 = smov 8  }
 0x307   : > { %3025 = dma.vmem_to_hbm [thread:$0]  (%p4755_p8), %s4558_s11, 4096, %s4563_s16, %s4567_s0, %s3730_s22, %s3731_s23, %s3732_s21  }
 0x308 PF: > { %s4756_s5 = sld [smem:[#allocation17_spill]]  ;;  %s4757_s18 = sld [smem:[#allocation32_spill]] }
 0x309   : > { %p3045_p1 = scmp.ge.s32.totalorder %s3717_s7, 2 }
 0x30e   : > { %s2567_s1 = sand.u32 1, %s4756_s5   ;;  %p4758_p9 = scmp.ne.s32.totalorder %s4757_s18, 0 }
 0x30f   : > { %s2568_s24 = scalar_lea.sflag [#allocation5], %s2567_s1 }
 0x310   : > { %p3041_p13 = pnand %p3045_p1, %p4758_p9 }
 0x312   : > { %3640 = dma.done.wait (!%p3041_p13), %s2568_s24, 4096  }
 0x313   : > { %3642 = vsyncadd (!%p3041_p13), %s2568_s24, 4294963200  ;;  %s26_s7 = sadd.s32 1, %s3717_s7   ;;  %s4760_s15 = sld [smem:[#allocation18_spill]] }
 0x314   : > { %p4596_p2 = scmp.ge.s32.totalorder %s26_s7, 34   ;;  %s4761_s18 = sld [smem:[#allocation20_spill]] }
 0x315   : > { %s4762_s21 = sld [smem:[#allocation21_spill]]  ;;  %s4763_s22 = sld [smem:[#allocation22_spill]] }
 0x316   : > { %s4764_s23 = sld [smem:[#allocation31_spill]]  ;;  %s4765_s12 = smov %s4005_s19 }
 0x317   : > { %s4766_s28 = sld [smem:[#allocation26_spill]]  ;;  %s4767_s11 = sld [smem:[#allocation27_spill]] }
 0x318   : > { %s4768_s5 = sld [smem:[#allocation28_spill]]  ;;  %s4769_s16 = smov %s3653_s17 }
 0x319   : > { %s4770_s0 = sld [smem:[#allocation33_spill]]  ;;  %s4771_s17 = smov %s4008_s3 }
 0x31a   : > { %s4773_s19 = smov %s3665_s20  ;;  %s4774_s20 = smov %s4062_s14 }
 0x31b   : > { %s4775_s24 = smov %s3685_s25  ;;  %s4776_s25 = smov %s3689_s26 }
 0x31c   : > { %s4777_s26 = smov %s4765_s12  ;;  %s4778_s27 = smov %s3705_s30 }
 0x31d   : > { %s4779_s29 = smov %s3713_s6  ;;  %s4780_s30 = smov %s4767_s11 }
 0x31e   :  { %25 = sbr.rel (!%p4596_p2) target bundleno = 23 (0x17), region = 126 }
 0x31f   : > { %s4781_s6 = smov %s4770_s0 }
 0x325   :  { %2573 = vsyncpa [#allocation4], 1 }
 0x326   :  { %2575 = vsyncpa [#allocation4 + $0x1], 1 }
 0x327   :  { %2576 = vsyncpa [#allocation7], 1 }
 0x328   :  { %2578 = vsyncpa [#allocation7 + $0x1], 1 }
 0x329   :  { %2579 = vsyncpa [#allocation10], 1 }
 0x32a   :  { %2581 = vsyncpa [#allocation10 + $0x1], 1 }
 0x32b   :  { %2582 = vsyncpa [#allocation5], 1 }
 0x32c   :  { %2584 = vsyncpa [#allocation5 + $0x1], 1 }

</bundles_post_ra>
